<compile_context>
chip_gen: v6e
topology: v6e:2x2x1
jax: 0.10.0
libtpu: 0.0.40
codegen_flags: <defaults>
</compile_context>

<pallas_src>
import functools

import jax
import jax.numpy as jnp
from jax.experimental import pallas as pl
from jax.experimental.pallas import tpu as pltpu

INPUT_DIM = 74 * 75     # 5550
HIDDEN_DIM = 100
OUTPUT_DIM = 10

LANE = 128
SUBLANE = 8


def _round_up(x, m):
    return (x + m - 1) // m * m


IN_LANE_PAD = _round_up(INPUT_DIM, LANE)   # 5632: layout-padding estimate only (x is NOT padded)
HID_PAD = _round_up(HIDDEN_DIM, LANE)      # 128
OUT_PAD = _round_up(OUTPUT_DIM, LANE)      # 128


def _tpu_vmem_capacity():
    try:
        return int(pltpu.get_tpu_info().vmem_capacity_bytes)
    except Exception:
        return 64 << 20   # conservative fallback (v7x per-TC physical VMEM)


def _choose_tile(batch, vmem_capacity):
    """Batch tile: multiple of 8 sublanes, aiming for >= ~4 grid steps so the pipeline
    overlaps DMA with compute and both v7x TensorCores get work; capped so the
    double-buffered x tile fits comfortably in VMEM."""
    cap = 1024 if vmem_capacity >= (96 << 20) else 512   # larger tiles on 128 MiB chips
    tb = _round_up(pl.cdiv(batch, 4), SUBLANE)
    return max(SUBLANE, min(tb, cap))


def mlp_kernel(x_ref, w1_ref, b1_ref, w2_ref, b2_ref, w3_ref, b3_ref, o_ref):
    # fc1 + ReLU
    h1 = jnp.dot(x_ref[...], w1_ref[...], preferred_element_type=jnp.float32)
    h1 = jnp.maximum(h1 + b1_ref[...], 0.0)
    # fc2 + ReLU
    h2 = jnp.dot(h1, w2_ref[...], preferred_element_type=jnp.float32)
    h2 = jnp.maximum(h2 + b2_ref[...], 0.0)
    # fc3 (no activation)
    out = jnp.dot(h2, w3_ref[...], preferred_element_type=jnp.float32) + b3_ref[...]
    o_ref[...] = out.astype(o_ref.dtype)


def prepare_params(w1, b1, w2, b2, w3, b3):
    """Pad weights/biases once, outside the per-call hot path.

    Exact math: padded output cols of w1/b1 are zero -> padded hidden units are 0 and
    stay 0 through ReLU; padded rows of w2/w3 multiply those zeros; padded output
    columns are sliced off in the wrapper.  w1's input dim (5550) is NOT padded.
    """
    w1_p = jnp.pad(w1, ((0, 0), (0, HID_PAD - HIDDEN_DIM)))
    b1_p = jnp.pad(b1, (0, HID_PAD - HIDDEN_DIM)).reshape(1, HID_PAD)
    w2_p = jnp.pad(w2, ((0, HID_PAD - HIDDEN_DIM), (0, HID_PAD - HIDDEN_DIM)))
    b2_p = jnp.pad(b2, (0, HID_PAD - HIDDEN_DIM)).reshape(1, HID_PAD)
    w3_p = jnp.pad(w3, ((0, HID_PAD - HIDDEN_DIM), (0, OUT_PAD - OUTPUT_DIM)))
    b3_p = jnp.pad(b3, (0, OUT_PAD - OUTPUT_DIM)).reshape(1, OUT_PAD)
    return w1_p, b1_p, w2_p, b2_p, w3_p, b3_p


@functools.partial(jax.jit, static_argnames=("tile_b",))
def feedforward_mlp(x, w1_p, b1_p, w2_p, b2_p, w3_p, b3_p, tile_b=None):
    """x: [B, INPUT_DIM] f32 (unpadded); params pre-padded via prepare_params."""
    B = x.shape[0]
    vmem_capacity = _tpu_vmem_capacity()
    tb = tile_b if tile_b is not None else _choose_tile(B, vmem_capacity)
    # Partial trailing block is fine: its out-of-bounds rows are never written back.
    grid = (pl.cdiv(B, tb),)

    # VMEM footprint estimate (f32, lane-padded on-chip layout), incl. double buffers.
    vmem_need = 4 * (
        2 * tb * IN_LANE_PAD          # x tile (double-buffered)
        + 2 * tb * OUT_PAD            # out tile (double-buffered)
        + 2 * INPUT_DIM * HID_PAD     # w1 (constant index map -> fetched once)
        + 2 * 2 * HID_PAD * HID_PAD   # w2, w3
        + 3 * 2 * HID_PAD             # biases
        + 2 * tb * HID_PAD            # intermediate activations
    )
    vmem_limit = min(int(vmem_capacity * 0.85),
                     max(32 << 20, int(vmem_need * 1.25)))

    flops = 2 * B * (INPUT_DIM * HID_PAD + HID_PAD * HID_PAD + HID_PAD * OUT_PAD)
    bytes_accessed = 4 * (
        B * INPUT_DIM + INPUT_DIM * HID_PAD + 2 * HID_PAD * HID_PAD
        + 3 * HID_PAD + B * OUT_PAD
    )

    out_p = pl.pallas_call(
        mlp_kernel,
        out_shape=jax.ShapeDtypeStruct((B, OUT_PAD), jnp.float32),
        grid=grid,
        in_specs=[
            pl.BlockSpec((tb, INPUT_DIM), lambda i: (i, 0)),       # x: unpadded, streamed per tile
            pl.BlockSpec((INPUT_DIM, HID_PAD), lambda i: (0, 0)),  # w1: VMEM-resident
            pl.BlockSpec((1, HID_PAD), lambda i: (0, 0)),          # b1
            pl.BlockSpec((HID_PAD, HID_PAD), lambda i: (0, 0)),    # w2
            pl.BlockSpec((1, HID_PAD), lambda i: (0, 0)),          # b2
            pl.BlockSpec((HID_PAD, OUT_PAD), lambda i: (0, 0)),    # w3
            pl.BlockSpec((1, OUT_PAD), lambda i: (0, 0)),          # b3
        ],
        out_specs=pl.BlockSpec((tb, OUT_PAD), lambda i: (i, 0)),
        compiler_params=pltpu.CompilerParams(
            dimension_semantics=("parallel",),
            vmem_limit_bytes=vmem_limit,
        ),
        cost_estimate=pl.CostEstimate(
            flops=flops, transcendentals=0, bytes_accessed=bytes_accessed
        ),
    )(x, w1_p, b1_p, w2_p, b2_p, w3_p, b3_p)

    # Strip the padded output columns (only lane padding remains; batch is unpadded).
    return out_p[:, :OUTPUT_DIM]


def init_linear(key, in_dim, out_dim):
    """Deterministic init mimicking torch.nn.Linear default (U(-1/sqrt(in), 1/sqrt(in)))."""
    kw, kb = jax.random.split(key)
    bound = 1.0 / jnp.sqrt(in_dim)
    # Stored as (in, out) so the kernel computes x @ W (== x @ W_torch.T).
    w = jax.random.uniform(kw, (in_dim, out_dim), jnp.float32, -bound, bound)
    b = jax.random.uniform(kb, (out_dim,), jnp.float32, -bound, bound)
    return w, b


if __name__ == "__main__":
    key = jax.random.PRNGKey(0)
    kx, k1, k2, k3 = jax.random.split(key, 4)

    # Small, deterministic test.  batch=20 exercises the multi-step batch grid and the
    # partial trailing block (20 is not a multiple of the tile); production batches use
    # the same code path with larger auto-selected tiles.
    batch = 20
    x = jax.random.normal(kx, (batch, INPUT_DIM), jnp.float32)

    w1, b1 = init_linear(k1, INPUT_DIM, HIDDEN_DIM)
    w2, b2 = init_linear(k2, HIDDEN_DIM, HIDDEN_DIM)
    w3, b3 = init_linear(k3, HIDDEN_DIM, OUTPUT_DIM)

    # Pad params once, outside the hot path.
    params_p = prepare_params(w1, b1, w2, b2, w3, b3)

    # Auto tile path (tb=8 here -> grid=(3,), partial last block).
    out = feedforward_mlp(x, *params_p)
    jax.block_until_ready(out)

    # Reference check in plain JAX (same math as the PyTorch forward).
    ref = jnp.maximum(x @ w1 + b1, 0.0)
    ref = jnp.maximum(ref @ w2 + b2, 0.0)
    ref = ref @ w3 + b3
    assert out.shape == (batch, OUTPUT_DIM)
    assert jnp.allclose(out, ref, atol=1e-4, rtol=1e-4)

    # Also exercise an explicit tile that does not divide the batch (grid=(2,), last
    # block partial with 4 valid rows).
    out2 = feedforward_mlp(x, *params_p, tile_b=16)
    jax.block_until_ready(out2)
    assert jnp.allclose(out2, ref, atol=1e-4, rtol=1e-4)

    print("KERNEL_OK")
</pallas_src>

<mosaic_0001>
module attributes {stable_mosaic.version = 11 : i64} {
  func.func @mlp_kernel(%arg0: i32, %arg1: memref<8x5550xf32, #tpu.memory_space<vmem>>, %arg2: memref<5550x128xf32, #tpu.memory_space<vmem>>, %arg3: memref<1x128xf32, #tpu.memory_space<vmem>>, %arg4: memref<128x128xf32, #tpu.memory_space<vmem>>, %arg5: memref<1x128xf32, #tpu.memory_space<vmem>>, %arg6: memref<128x128xf32, #tpu.memory_space<vmem>>, %arg7: memref<1x128xf32, #tpu.memory_space<vmem>>, %arg8: memref<8x128xf32, #tpu.memory_space<vmem>>) attributes {dimension_semantics = [#tpu.dimension_semantics<parallel>], iteration_bounds = array<i64: 3>, scalar_prefetch = 0 : i64, scratch_operands = 0 : i64, tpu.core_type = #tpu.core_type<tc>, window_params = [{transform_indices = @transform_0, window_bounds = array<i64: 8, 5550>}, {pipeline_mode = #tpu.pipeline_mode<synchronous>, transform_indices = @transform_1, window_bounds = array<i64: 5550, 128>}, {pipeline_mode = #tpu.pipeline_mode<synchronous>, transform_indices = @transform_2, window_bounds = array<i64: 1, 128>}, {pipeline_mode = #tpu.pipeline_mode<synchronous>, transform_indices = @transform_3, window_bounds = array<i64: 128, 128>}, {pipeline_mode = #tpu.pipeline_mode<synchronous>, transform_indices = @transform_4, window_bounds = array<i64: 1, 128>}, {pipeline_mode = #tpu.pipeline_mode<synchronous>, transform_indices = @transform_5, window_bounds = array<i64: 128, 128>}, {pipeline_mode = #tpu.pipeline_mode<synchronous>, transform_indices = @transform_6, window_bounds = array<i64: 1, 128>}, {transform_indices = @transform_7, window_bounds = array<i64: 8, 128>}]} {
    %c0 = arith.constant 0 : index
    %c0_0 = arith.constant 0 : index
    %0 = vector.load %arg1[%c0, %c0_0] : memref<8x5550xf32, #tpu.memory_space<vmem>>, vector<8x5550xf32>
    %c0_1 = arith.constant 0 : index
    %c0_2 = arith.constant 0 : index
    %1 = vector.load %arg2[%c0_1, %c0_2] : memref<5550x128xf32, #tpu.memory_space<vmem>>, vector<5550x128xf32>
    %cst = arith.constant dense<0.000000e+00> : vector<8x128xf32>
    %2 = tpu.matmul %0, %1, %cst {dimension_numbers = #tpu.dot_dimension_numbers<[1], [0], [0], [1], [0, 0, 1, 1], [], []>} : vector<8x5550xf32>, vector<5550x128xf32>, vector<8x128xf32> -> vector<8x128xf32>
    %c0_3 = arith.constant 0 : index
    %c0_4 = arith.constant 0 : index
    %3 = vector.load %arg3[%c0_3, %c0_4] : memref<1x128xf32, #tpu.memory_space<vmem>>, vector<1x128xf32>
    %4 = vector.broadcast %3 : vector<1x128xf32> to vector<8x128xf32>
    %5 = arith.addf %2, %4 : vector<8x128xf32>
    %cst_5 = arith.constant 0.000000e+00 : f32
    %6 = vector.broadcast %cst_5 : f32 to vector<8x128xf32>
    %7 = arith.maximumf %5, %6 : vector<8x128xf32>
    %c0_6 = arith.constant 0 : index
    %c0_7 = arith.constant 0 : index
    %8 = vector.load %arg4[%c0_6, %c0_7] : memref<128x128xf32, #tpu.memory_space<vmem>>, vector<128x128xf32>
    %cst_8 = arith.constant dense<0.000000e+00> : vector<8x128xf32>
    %9 = tpu.matmul %7, %8, %cst_8 {dimension_numbers = #tpu.dot_dimension_numbers<[1], [0], [0], [1], [0, 0, 1, 1], [], []>} : vector<8x128xf32>, vector<128x128xf32>, vector<8x128xf32> -> vector<8x128xf32>
    %c0_9 = arith.constant 0 : index
    %c0_10 = arith.constant 0 : index
    %10 = vector.load %arg5[%c0_9, %c0_10] : memref<1x128xf32, #tpu.memory_space<vmem>>, vector<1x128xf32>
    %11 = vector.broadcast %10 : vector<1x128xf32> to vector<8x128xf32>
    %12 = arith.addf %9, %11 : vector<8x128xf32>
    %cst_11 = arith.constant 0.000000e+00 : f32
    %13 = vector.broadcast %cst_11 : f32 to vector<8x128xf32>
    %14 = arith.maximumf %12, %13 : vector<8x128xf32>
    %c0_12 = arith.constant 0 : index
    %c0_13 = arith.constant 0 : index
    %15 = vector.load %arg6[%c0_12, %c0_13] : memref<128x128xf32, #tpu.memory_space<vmem>>, vector<128x128xf32>
    %cst_14 = arith.constant dense<0.000000e+00> : vector<8x128xf32>
    %16 = tpu.matmul %14, %15, %cst_14 {dimension_numbers = #tpu.dot_dimension_numbers<[1], [0], [0], [1], [0, 0, 1, 1], [], []>} : vector<8x128xf32>, vector<128x128xf32>, vector<8x128xf32> -> vector<8x128xf32>
    %c0_15 = arith.constant 0 : index
    %c0_16 = arith.constant 0 : index
    %17 = vector.load %arg7[%c0_15, %c0_16] : memref<1x128xf32, #tpu.memory_space<vmem>>, vector<1x128xf32>
    %18 = vector.broadcast %17 : vector<1x128xf32> to vector<8x128xf32>
    %19 = arith.addf %16, %18 : vector<8x128xf32>
    %c0_17 = arith.constant 0 : index
    %c0_18 = arith.constant 0 : index
    %20 = vector.load %arg8[%c0_17, %c0_18] : memref<8x128xf32, #tpu.memory_space<vmem>>, vector<8x128xf32>
    tpu.vector_store %arg8[%c0_17, %c0_18], %19 {strides = array<i32>} : memref<8x128xf32, #tpu.memory_space<vmem>>, vector<8x128xf32>,
    return
  }
  func.func @transform_0(%arg0: i32) -> (i32, i32) {
    %c0_i32 = arith.constant 0 : i32
    %c0_i32_0 = arith.constant 0 : i32
    return %arg0, %c0_i32 : i32, i32
  }
  func.func @transform_1(%arg0: i32) -> (i32, i32) {
    %c0_i32 = arith.constant 0 : i32
    %c0_i32_0 = arith.constant 0 : i32
    %c0_i32_1 = arith.constant 0 : i32
    return %c0_i32, %c0_i32_0 : i32, i32
  }
  func.func @transform_2(%arg0: i32) -> (i32, i32) {
    %c0_i32 = arith.constant 0 : i32
    %c0_i32_0 = arith.constant 0 : i32
    %c0_i32_1 = arith.constant 0 : i32
    return %c0_i32, %c0_i32_0 : i32, i32
  }
  func.func @transform_3(%arg0: i32) -> (i32, i32) {
    %c0_i32 = arith.constant 0 : i32
    %c0_i32_0 = arith.constant 0 : i32
    %c0_i32_1 = arith.constant 0 : i32
    return %c0_i32, %c0_i32_0 : i32, i32
  }
  func.func @transform_4(%arg0: i32) -> (i32, i32) {
    %c0_i32 = arith.constant 0 : i32
    %c0_i32_0 = arith.constant 0 : i32
    %c0_i32_1 = arith.constant 0 : i32
    return %c0_i32, %c0_i32_0 : i32, i32
  }
  func.func @transform_5(%arg0: i32) -> (i32, i32) {
    %c0_i32 = arith.constant 0 : i32
    %c0_i32_0 = arith.constant 0 : i32
    %c0_i32_1 = arith.constant 0 : i32
    return %c0_i32, %c0_i32_0 : i32, i32
  }
  func.func @transform_6(%arg0: i32) -> (i32, i32) {
    %c0_i32 = arith.constant 0 : i32
    %c0_i32_0 = arith.constant 0 : i32
    %c0_i32_1 = arith.constant 0 : i32
    return %c0_i32, %c0_i32_0 : i32, i32
  }
  func.func @transform_7(%arg0: i32) -> (i32, i32) {
    %c0_i32 = arith.constant 0 : i32
    %c0_i32_0 = arith.constant 0 : i32
    return %arg0, %c0_i32 : i32, i32
  }
}

</mosaic_0001>

<bundles_post_ra>
// kernel: feedforward_mlp.1
= control target key start
LH: loop header
LB: loop body
LE: loop exit
PB: predicated region body
PF: predicated region fallthrough
CT: control target
= control target key end

     0   :  { %12 = vsyncpa [#allocation3], 0  ;;  %s4519_s0 = inlined_call_operand.hbm [shape: f32[20,5550], index: 0, kind: input, shape index: {}]   ;;  %s4520_s1 = inlined_call_operand.hbm [shape: f32[5550,128], index: 1, kind: input, shape index: {}]   ;;  %s4521_s2 = inlined_call_operand.hbm [shape: f32[1,128], index: 2, kind: input, shape index: {}]   ;;  %s4522_s3 = inlined_call_operand.hbm [shape: f32[128,128], index: 3, kind: input, shape index: {}]   ;;  %s4523_s4 = inlined_call_operand.hbm [shape: f32[1,128], index: 4, kind: input, shape index: {}]   ;;  %s4524_s5 = inlined_call_operand.hbm [shape: f32[128,128], index: 5, kind: input, shape index: {}]   ;;  %s4525_s6 = inlined_call_operand.hbm [shape: f32[1,128], index: 6, kind: input, shape index: {}]   ;;  %s4526_s7 = inlined_call_operand.vmem [shape: f32[20,128], index: 7, kind: output, shape index: {}]  }
   0x1   :  { %14 = vsyncpa [#allocation3 + $0x1], 0 }
   0x2   :  { %15 = vsyncpa [#allocation5], 0 }
   0x3   :  { %16 = vsyncpa [#allocation8], 0 }
   0x4   :  { %17 = vsyncpa [#allocation11], 0  ;;  %s4234_s24 = smov 0   ;;  %s4236_s25 = smov 0  }
   0x5   :  { %s4238_s26 = smov 0   ;;  %s4240_s27 = smov 0  }
   0x6 LB: > { %s4183_s28 = smov [#allocation4]   ;;  %s4255_s30 = sadd.s32 4294967295, %s4181_s27   ;;  %s4181_s27 = sphi %s4240_s27, %s4547_s27   ;;  %s4177_s26 = sphi %s4238_s26, %s4546_s26   ;;  %s4173_s25 = sphi %s4236_s25, %s4545_s25   ;;  %s4169_s24 = sphi %s4234_s24, %s4544_s24  }
   0x7   : > { %s218_s29 = sshll.u32 %s4183_s28, 4  ;;  %p2981_p0 = scmp.ge.s32.totalorder %s4181_s27, 1  ;;  %s219_s29 = int_to_ptr.vmem [resolvable:$true] %s218_s29 }
   0x8   : > { %p4527_p1 = scmp.eq.s32.totalorder %s4255_s30, 0  ;;  %p206_p2 = scmp.lt.s32.totalorder %s4181_s27, 4 }
   0x9   : > { %s4184_s9 = smov [#allocation7]   ;;  %s4185_s12 = smov [#allocation10]  }
   0xa   : > { %p4260_p3 = pnand %p2981_p0, %p206_p2  ;;  %s242_s10 = sshll.u32 %s4184_s9, 4  ;;  %s4272_s10 = int_to_ptr.vmem [resolvable:$true] %s242_s10 }
   0xb   : > { %s266_s13 = sshll.u32 %s4185_s12, 4  ;;  %s3962_s15 = scalar_lea.vmem %s219_s29, 88832  ;;  %s4274_s13 = int_to_ptr.vmem [resolvable:$true] %s266_s13 }
   0xc   : > { %s4530_s8 = scalar_select %p4260_p3, 1, 0 }
   0xd   : > { %p3873_p4 = pneg %p4260_p3  ;;  %p3963_p7 = scmp.ne.s32.totalorder %s219_s29, %s3962_s15 }
   0xe   : > { %p3970_p10 = scmp.lt.s32.totalorder %s219_s29, %s219_s29  ;;  %p3971_p11 = scmp.lt.s32.totalorder %s3962_s15, %s3962_s15 }
   0xf   : > { %p4268_p5 = pnand %p3873_p4, %p4527_p1 }
  0x10   : > { %p3972_p12 = por %p3971_p11, %p3970_p10 }
  0x11   : > { %p4278_p6 = pneg %p4268_p5 }
  0x13   : > { %p3965_p8 = pnand %p3963_p7, %p4278_p6 }
  0x15   : > { %p3966_p9 = pneg %p3965_p8 }
  0x17   : > { %p3973_p13 = pnand %p3972_p12, %p3966_p9 }
  0x19   : > { %3976 = shalt.err (!%p3973_p13)
}
  0x1a   : > { %s4186_s16 = smov 128   ;;  %s4187_s17 = smov 8  }
  0x1b   : > { %3876 = dma.hbm_to_vmem [thread:$0]  (!%p4268_p5), %s4520_s1, 88832, %s219_s29, [#allocation5], %s4186_s16, %s4186_s16, %s4187_s17  }
  0x1c   : > { %s3988_s20 = scalar_lea.vmem %s4272_s10, 2048  ;;  %p3996_p7 = scmp.lt.s32.totalorder %s4272_s10, %s4272_s10 }
  0x1d   : > { %p3989_p0 = scmp.ne.s32.totalorder %s4272_s10, %s3988_s20  ;;  %p3997_p8 = scmp.lt.s32.totalorder %s3988_s20, %s3988_s20 }
  0x1f   : > { %p3991_p2 = pnand %p3989_p0, %p4278_p6  ;;  %p3998_p9 = por %p3997_p8, %p3996_p7 }
  0x21   : > { %p3992_p4 = pneg %p3991_p2 }
  0x23   : > { %p3999_p10 = pnand %p3998_p9, %p3992_p4 }
  0x25   : > { %4002 = shalt.err (!%p3999_p10)
}
  0x26   : > { %3882 = dma.hbm_to_vmem [thread:$0]  (!%p4268_p5), %s4522_s3, 2048, %s4272_s10, [#allocation8], %s4186_s16, %s4186_s16, %s4187_s17  }
  0x27   : > { %s4014_s23 = scalar_lea.vmem %s4274_s13, 2048  ;;  %p4022_p0 = scmp.lt.s32.totalorder %s4274_s13, %s4274_s13 }
  0x28   : > { %p4015_p11 = scmp.ne.s32.totalorder %s4274_s13, %s4014_s23  ;;  %p4023_p2 = scmp.lt.s32.totalorder %s4014_s23, %s4014_s23 }
  0x2a   : > { %p4017_p12 = pnand %p4015_p11, %p4278_p6  ;;  %p4024_p4 = por %p4023_p2, %p4022_p0 }
  0x2c   : > { %p4018_p13 = pneg %p4017_p12 }
  0x2e   : > { %p4025_p7 = pnand %p4024_p4, %p4018_p13 }
  0x30   : > { %4028 = shalt.err (!%p4025_p7)
}
  0x31   : > { %3888 = dma.hbm_to_vmem [thread:$0]  (!%p4268_p5), %s4524_s5, 2048, %s4274_s13, [#allocation11], %s4186_s16, %s4186_s16, %s4187_s17  }
  0x32   : > { %s4188_s9 = smov [#allocation6]   ;;  %s4189_s12 = smov [#allocation9]  }
  0x33   : > { %s232_s10 = sshll.u32 %s4188_s9, 4  ;;  %s256_s15 = sshll.u32 %s4189_s12, 4  ;;  %s233_s10 = int_to_ptr.vmem [resolvable:$true] %s232_s10  ;;  %s257_s15 = int_to_ptr.vmem [resolvable:$true] %s256_s15 }
  0x34   : > { %s4040_s18 = scalar_lea.vmem %s233_s10, 16  ;;  %s4047_s19 = scalar_lea.vmem %s233_s10, 32 }
  0x35   : > { %p4041_p8 = scmp.ne.s32.totalorder %s233_s10, %s4040_s18  ;;  %p4048_p11 = scmp.lt.s32.totalorder %s233_s10, %s233_s10 }
  0x36   : > { %p4049_p12 = scmp.lt.s32.totalorder %s4047_s19, %s4040_s18 }
  0x37   : > { %p4043_p9 = pnand %p4041_p8, %p4278_p6 }
  0x38   : > { %p4050_p13 = por %p4049_p12, %p4048_p11 }
  0x39   : > { %p4044_p10 = pneg %p4043_p9 }
  0x3b   : > { %p4051_p0 = pnand %p4050_p13, %p4044_p10 }
  0x3d   : > { %4054 = shalt.err (!%p4051_p0)
}
  0x3e   : > { %3879 = dma.hbm_to_vmem [thread:$0]  (!%p4268_p5), %s4521_s2, 16, %s233_s10, [#allocation5]  }
  0x3f   : > { %s4066_s16 = scalar_lea.vmem %s257_s15, 16  ;;  %s4073_s17 = scalar_lea.vmem %s257_s15, 32 }
  0x40   : > { %p4067_p2 = scmp.ne.s32.totalorder %s257_s15, %s4066_s16  ;;  %p4074_p8 = scmp.lt.s32.totalorder %s257_s15, %s257_s15 }
  0x41   : > { %p4075_p9 = scmp.lt.s32.totalorder %s4073_s17, %s4066_s16 }
  0x42   : > { %p4069_p4 = pnand %p4067_p2, %p4278_p6 }
  0x43   : > { %p4076_p1 = por %p4075_p9, %p4074_p8 }
  0x44   : > { %p4070_p7 = pneg %p4069_p4 }
  0x46   : > { %p4077_p11 = pnand %p4076_p1, %p4070_p7 }
  0x48   : > { %4080 = shalt.err (!%p4077_p11)
}
  0x49   : > { %3885 = dma.hbm_to_vmem [thread:$0]  (!%p4268_p5), %s4523_s4, 16, %s257_s15, [#allocation8]  }
  0x4a   : > { %s4190_s23 = smov [#allocation12]  }
  0x4b   : > { %s280_s28 = sshll.u32 %s4190_s23, 4  ;;  %s281_s28 = int_to_ptr.vmem [resolvable:$true] %s280_s28 }
  0x4c   : > { %s4092_s29 = scalar_lea.vmem %s281_s28, 16  ;;  %s4099_s9 = scalar_lea.vmem %s281_s28, 32 }
  0x4d   : > { %p4093_p10 = scmp.ne.s32.totalorder %s281_s28, %s4092_s29  ;;  %p4100_p0 = scmp.lt.s32.totalorder %s281_s28, %s281_s28 }
  0x4e   : > { %p4101_p2 = scmp.lt.s32.totalorder %s4099_s9, %s4092_s29 }
  0x4f   : > { %p4095_p12 = pnand %p4093_p10, %p4278_p6 }
  0x50   : > { %p4102_p1 = por %p4101_p2, %p4100_p0 }
  0x51   : > { %p4096_p13 = pneg %p4095_p12 }
  0x53   : > { %p4103_p4 = pnand %p4102_p1, %p4096_p13 }
  0x55   : > { %4106 = shalt.err (!%p4103_p4)
}
  0x56   : > { %3891 = dma.hbm_to_vmem [thread:$0]  (!%p4268_p5), %s4525_s6, 16, %s281_s28, [#allocation11]  }
  0x57   : > { %s4335_s14 = sadd.s32 1, %s4181_s27   ;;  %s30_s11 = sadd.s32 1, %s4177_s26 }
  0x58   : > { %s27_s15 = ssub.s32 %s4181_s27, %s4335_s14  ;;  %p37_p6 = scmp.ne.s32.totalorder %s4177_s26, %s4173_s25 }
  0x59   : > { %p28_p7 = scmp.eq.s32.totalorder %s27_s15, 0  ;;  %p38_p8 = scmp.eq.s32.totalorder %s4181_s27, 0 }
  0x5a   : > { %p43_p9 = scmp.ne.s32.totalorder %s4173_s25, %s4169_s24  ;;  %p3902_p11 = scmp.lt.s32.totalorder %s4181_s27, 3 }
  0x5b   : > { %s4347_s18 = scalar_select %p28_p7, %s4177_s26, %s30_s11  }
  0x5c   : > { %p39_p10 = por %p38_p8, %p37_p6  ;;  %p4533_p12 = scmp.eq.s32.totalorder %s4255_s30, 0 }
  0x5d   : > { %s291_s20 = sand.u32 1, %s4177_s26   ;;  %s3845_s13 = smul.u32 5632, %s4181_s27 }
  0x5e   : > { %p4351_p13 = por %p4533_p12, %p43_p9  ;;  %s3844_s16 = smul.u32 352, %s291_s20 }
  0x5f   : > { %p4357_p5 = pnand %p3902_p11, %p39_p10  ;;  %s4364_s24 = scalar_lea.hbm %s4519_s0, %s3845_s13 }
  0x60   : > { %s4534_s19 = scalar_select %p4351_p13, 1, 0 }
  0x61   : > { %s295_s23 = scalar_lea.vmem [#allocation2], %s3844_s16  ;;  %s292_s29 = scalar_lea.sflag [#allocation3], %s291_s20 }
  0x62   : > { %s303_s28 = sshll.u32 %s295_s23, 4  ;;  %s4107_s9 = scalar_lea.hbm %s4364_s24, 5632  ;;  %s304_s28 = int_to_ptr.vmem [resolvable:$true] %s303_s28 }
  0x63   : > { %p4108_p0 = scmp.ne.s32.totalorder %s4364_s24, %s4107_s9  ;;  %p4109_p2 = pneg %p4357_p5 }
  0x64   : > { %s4112_s12 = scalar_lea.hbm %s4519_s0, 16896  ;;  %p4113_p6 = scmp.lt.s32.totalorder %s4364_s24, %s4519_s0 }
  0x65   : > { %p4110_p1 = pnand %p4109_p2, %p4108_p0  ;;  %p4114_p7 = scmp.lt.s32.totalorder %s4112_s12, %s4107_s9 }
  0x67   : > { %p4111_p4 = pneg %p4110_p1  ;;  %p4115_p8 = por %p4114_p7, %p4113_p6 }
  0x69   : > { %p4116_p9 = pnand %p4115_p8, %p4111_p4 }
  0x6b   : > { %4119 = shalt.err (!%p4116_p9)
}
  0x6c   : > { %s4120_s13 = scalar_lea.vmem %s304_s28, 5632  ;;  %s4191_s20 = smov [#allocation2]  }
  0x6d   : > { %p4121_p11 = scmp.ne.s32.totalorder %s304_s28, %s4120_s13  ;;  %s4125_s16 = sshll.u32 %s4191_s20, 4  ;;  %s4126_s16 = int_to_ptr.vmem [resolvable:$false] %s4125_s16 }
  0x6e   : > { %s4127_s21 = scalar_lea.vmem %s4126_s16, 11264  ;;  %p4128_p0 = scmp.lt.s32.totalorder %s304_s28, %s4126_s16 }
  0x6f   : > { %p4123_p10 = pnand %p4121_p11, %p4109_p2  ;;  %p4129_p1 = scmp.lt.s32.totalorder %s4127_s21, %s4120_s13 }
  0x71   : > { %p4124_p12 = pneg %p4123_p10  ;;  %p4130_p13 = por %p4129_p1, %p4128_p0 }
  0x73   : > { %p4131_p3 = pnand %p4130_p13, %p4124_p12 }
  0x75   : > { %4134 = shalt.err (!%p4131_p3)
}
  0x76   : > { %3895 = dma.hbm_to_vmem [thread:$0]  (!%p4357_p5), %s4364_s24, 5632, %s304_s28, %s292_s29  }
  0x77   : > { %p4536_p4 = scmp.ne.s32.totalorder %s4530_s8, 0 }
  0x78   : > { %s314_s22 = sand.u32 (!%p4536_p4), 1, %s4173_s25   ;;  %p4537_p2 = scmp.ne.s32.totalorder (!%p4536_p4), %s4534_s19, 0 }
  0x79   : > { %312 = sbr.rel (%p4536_p4) target bundleno = 1113 (0x459), region = 48  ;;  %s315_s9 = scalar_lea.sflag (!%p4536_p4), [#allocation3], %s314_s22 }
  0x7a   : > { %s3846_s23 = smul.u32 (!%p4536_p4), 352, %s314_s22 }
  0x7c   : > { %s4383_s27 = scalar_lea.vmem (!%p4536_p4), [#allocation2], %s3846_s23 }
  0x7e   : > { %4152 = dma.done.wait (%p4537_p2), %s315_s9, 5632  }
  0x7f   : > { %4154 = vsyncadd (%p4537_p2), %s315_s9, 4294961664  ;;  %p4538_p3 = scmp.eq.s32.totalorder %s4255_s30, 0 }
  0x81   : > { %4156 = dma.done.wait (%p4538_p3), [#allocation5], 88848   ;;  %p4539_p13 = pmov %p4538_p3 }
  0x82   : > { %p4540_p5 = pmov %p4538_p3 }
  0x83   : > { %4158 = vsyncadd (%p4539_p13), [#allocation5], 4294878448 }
  0x84   : > { %4160 = dma.done.wait (%p4540_p5), [#allocation8], 2064   ;;  %p4541_p6 = pmov %p4538_p3 }
  0x85   : > { %p4542_p7 = pmov %p4538_p3 }
  0x86   : > { %4162 = vsyncadd (%p4541_p6), [#allocation8], 4294965232 }
  0x87   : > { %4164 = dma.done.wait (%p4542_p7), [#allocation11], 2064   ;;  %p4543_p8 = pmov %p4538_p3 }
  0x88   : > { %v451_v0 = vld [vmem:[#allocation4 + $0xf8] sm:$0xff]  ;;  %v450_v4 = vld [vmem:[#allocation4 + $0xf0] sm:$0xff]  ;;  %v449_v8 = vld [vmem:[#allocation4 + $0xe8] sm:$0xff]  ;;  %vm1121_vm0 = vcmask 375808   ;;  %vm1125_vm1 = vcmask 1045504   ;;  %vm4193_vm2 = vmmov 0  }
  0x89   : > { %4166 = vsyncadd (%p4543_p8), [#allocation11], 4294965232  ;;  %v483_v1 = vld [vmem:[#allocation4 + $0x1f8] sm:$0xff]  ;;  %3005 = vmatprep.subr.mxu0 %v451_v0  ;;  %v482_v5 = vld [vmem:[#allocation4 + $0x1f0] sm:$0xff]  ;;  %p372_p9 = scmp.lt.s32.totalorder %s4255_s30, 2 }
  0x8a   : > { %v435_v2 = vld [vmem:[#allocation4 + $0x78] sm:$0xff]  ;;  %3040 = vmatprep.subr.mxu1 %v483_v1  ;;  %v434_v6 = vld [vmem:[#allocation4 + $0x70] sm:$0xff]  ;;  %v481_v9 = vld [vmem:[#allocation4 + $0x1e8] sm:$0xff] }
  0x8b   : > { %v467_v3 = vld [vmem:[#allocation4 + $0x178] sm:$0xff]  ;;  %3006 = vmatpush3.msra.mxu0 %v435_v2  ;;  %v466_v7 = vld [vmem:[#allocation4 + $0x170] sm:$0xff]  ;;  %v433_v10 = vld [vmem:[#allocation4 + $0x68] sm:$0xff]  ;;  %s4549_s30 = smov (!%p372_p9, %s4255_s30), 2 }
  0x8c   : > { %3041 = vmatpush3.msra.mxu1 %v467_v3  ;;  %3007 = vmatprep.subr.mxu0 %v450_v4  ;;  %v465_v11 = vld [vmem:[#allocation4 + $0x168] sm:$0xff]  ;;  %v448_v12 = vld [vmem:[#allocation4 + $0xe0] sm:$0xff]  ;;  %v447_v16 = vld [vmem:[#allocation4 + $0xd8] sm:$0xff]  ;;  %s2997_s8 = sshll.u32 %s4549_s30, 3 }
  0x8d   : > { %3042 = vmatprep.subr.mxu1 %v482_v5  ;;  %3008 = vmatpush3.msra.mxu0 %v434_v6  ;;  %v480_v13 = vld [vmem:[#allocation4 + $0x1e0] sm:$0xff]  ;;  %v479_v17 = vld [vmem:[#allocation4 + $0x1d8] sm:$0xff]  ;;  %v446_v20 = vld [vmem:[#allocation4 + $0xd0] sm:$0xff]  ;;  %s375_s24 = scalar_lea.vmem %s4526_s7, %s2997_s8 }
  0x8e   : > { %3043 = vmatpush3.msra.mxu1 %v466_v7  ;;  %3009 = vmatprep.subr.mxu0 %v449_v8  ;;  %v432_v14 = vld [vmem:[#allocation4 + $0x60] sm:$0xff]  ;;  %v431_v18 = vld [vmem:[#allocation4 + $0x58] sm:$0xff]  ;;  %v478_v21 = vld [vmem:[#allocation4 + $0x1d0] sm:$0xff] }
  0x8f   : > { %3044 = vmatprep.subr.mxu1 %v481_v9  ;;  %v464_v15 = vld [vmem:[#allocation4 + $0x160] sm:$0xff]  ;;  %3010 = vmatpush3.msra.mxu0 %v433_v10  ;;  %v463_v19 = vld [vmem:[#allocation4 + $0x158] sm:$0xff]  ;;  %v430_v22 = vld [vmem:[#allocation4 + $0x50] sm:$0xff] }
  0x90   : > { %3045 = vmatpush3.msra.mxu1 %v465_v11  ;;  %3011 = vmatprep.subr.mxu0 %v448_v12  ;;  %v462_v23 = vld [vmem:[#allocation4 + $0x150] sm:$0xff]  ;;  %v445_v24 = vld [vmem:[#allocation4 + $0xc8] sm:$0xff]  ;;  %v444_v28 = vld [vmem:[#allocation4 + $0xc0] sm:$0xff] }
  0x91   : > { %3046 = vmatprep.subr.mxu1 %v480_v13  ;;  %3012 = vmatpush3.msra.mxu0 %v432_v14  ;;  %v477_v25 = vld [vmem:[#allocation4 + $0x1c8] sm:$0xff]  ;;  %v476_v29 = vld [vmem:[#allocation4 + $0x1c0] sm:$0xff]  ;;  %v443_v32 = vld [vmem:[#allocation4 + $0xb8] sm:$0xff] }
  0x92   : > { %3047 = vmatpush3.msra.mxu1 %v464_v15  ;;  %3013 = vmatprep.subr.mxu0 %v447_v16  ;;  %v429_v26 = vld [vmem:[#allocation4 + $0x48] sm:$0xff]  ;;  %v428_v30 = vld [vmem:[#allocation4 + $0x40] sm:$0xff]  ;;  %v475_v33 = vld [vmem:[#allocation4 + $0x1b8] sm:$0xff] }
  0x93   : > { %3048 = vmatprep.subr.mxu1 %v479_v17  ;;  %3014 = vmatpush3.msra.mxu0 %v431_v18  ;;  %v461_v27 = vld [vmem:[#allocation4 + $0x148] sm:$0xff]  ;;  %v460_v31 = vld [vmem:[#allocation4 + $0x140] sm:$0xff]  ;;  %v427_v34 = vld [vmem:[#allocation4 + $0x38] sm:$0xff] }
  0x94   : > { %3049 = vmatpush3.msra.mxu1 %v463_v19  ;;  %3015 = vmatprep.subr.mxu0 %v446_v20  ;;  %v459_v35 = vld [vmem:[#allocation4 + $0x138] sm:$0xff]  ;;  %v442_v36 = vld [vmem:[#allocation4 + $0xb0] sm:$0xff]  ;;  %v441_v40 = vld [vmem:[#allocation4 + $0xa8] sm:$0xff] }
  0x95   : > { %3050 = vmatprep.subr.mxu1 %v478_v21  ;;  %3016 = vmatpush3.msra.mxu0 %v430_v22  ;;  %v474_v37 = vld [vmem:[#allocation4 + $0x1b0] sm:$0xff]  ;;  %v473_v41 = vld [vmem:[#allocation4 + $0x1a8] sm:$0xff]  ;;  %v440_v44 = vld [vmem:[#allocation4 + $0xa0] sm:$0xff] }
  0x96   : > { %3051 = vmatpush3.msra.mxu1 %v462_v23  ;;  %3017 = vmatprep.subr.mxu0 %v445_v24  ;;  %v426_v38 = vld [vmem:[#allocation4 + $0x30] sm:$0xff]  ;;  %v425_v42 = vld [vmem:[#allocation4 + $0x28] sm:$0xff]  ;;  %v472_v45 = vld [vmem:[#allocation4 + $0x1a0] sm:$0xff] }
  0x97   : > { %3052 = vmatprep.subr.mxu1 %v477_v25  ;;  %3018 = vmatpush3.msra.mxu0 %v429_v26  ;;  %v458_v39 = vld [vmem:[#allocation4 + $0x130] sm:$0xff]  ;;  %v457_v43 = vld [vmem:[#allocation4 + $0x128] sm:$0xff]  ;;  %v424_v46 = vld [vmem:[#allocation4 + $0x20] sm:$0xff] }
  0x98   : > { %3053 = vmatpush3.msra.mxu1 %v461_v27  ;;  %3019 = vmatprep.subr.mxu0 %v444_v28  ;;  %v456_v47 = vld [vmem:[#allocation4 + $0x120] sm:$0xff]  ;;  %v439_v48 = vld [vmem:[#allocation4 + $0x98] sm:$0xff]  ;;  %v438_v52 = vld [vmem:[#allocation4 + $0x90] sm:$0xff] }
  0x99   : > { %3054 = vmatprep.subr.mxu1 %v476_v29  ;;  %3020 = vmatpush3.msra.mxu0 %v428_v30  ;;  %v471_v49 = vld [vmem:[#allocation4 + $0x198] sm:$0xff]  ;;  %v470_v53 = vld [vmem:[#allocation4 + $0x190] sm:$0xff]  ;;  %v437_v56 = vld [vmem:[#allocation4 + $0x88] sm:$0xff] }
  0x9a   : > { %3055 = vmatpush3.msra.mxu1 %v460_v31  ;;  %3021 = vmatprep.subr.mxu0 %v443_v32  ;;  %v423_v50 = vld [vmem:[#allocation4 + $0x18] sm:$0xff]  ;;  %v422_v54 = vld [vmem:[#allocation4 + $0x10] sm:$0xff]  ;;  %v469_v57 = vld [vmem:[#allocation4 + $0x188] sm:$0xff] }
  0x9b   : > { %3056 = vmatprep.subr.mxu1 %v475_v33  ;;  %3022 = vmatpush3.msra.mxu0 %v427_v34  ;;  %v455_v51 = vld [vmem:[#allocation4 + $0x118] sm:$0xff]  ;;  %v454_v55 = vld [vmem:[#allocation4 + $0x110] sm:$0xff]  ;;  %v421_v58 = vld [vmem:[#allocation4 + $0x8] sm:$0xff] }
  0x9c   : > { %3057 = vmatpush3.msra.mxu1 %v459_v35  ;;  %3023 = vmatprep.subr.mxu0 %v442_v36  ;;  %v453_v59 = vld [vmem:[#allocation4 + $0x108] sm:$0xff]  ;;  %v436_v60 = vld [vmem:[#allocation4 + $0x80] sm:$0xff]  ;;  %v379_v1 = vld [vmem:[%s4383_s27 + $0x18] sm:$0xff] }
  0x9d   : > { %3058 = vmatprep.subr.mxu1 %v474_v37  ;;  %3024 = vmatpush3.msra.mxu0 %v426_v38  ;;  %v468_v61 = vld [vmem:[#allocation4 + $0x180] sm:$0xff]  ;;  %v377_v63 = vld [vmem:[%s4383_s27 + $0x8] sm:$0xff]  ;;  %v378_v3 = vld [vmem:[%s4383_s27 + $0x10] sm:$0xff] }
  0x9e   : > { %3059 = vmatpush3.msra.mxu1 %v458_v39  ;;  %3025 = vmatprep.subr.mxu0 %v441_v40  ;;  %v420_v62 = vld [vmem:[#allocation4] sm:$0xff]  ;;  %v515_v4 = vld [vmem:[#allocation4 + $0x2f8] sm:$0xff]  ;;  %v514_v8 = vld [vmem:[#allocation4 + $0x2f0] sm:$0xff] }
  0x9f   : > { %3060 = vmatprep.subr.mxu1 %v473_v41  ;;  %3026 = vmatpush3.msra.mxu0 %v425_v42  ;;  %v452_v0 = vld [vmem:[#allocation4 + $0x100] sm:$0xff]  ;;  %v547_v5 = vld [vmem:[#allocation4 + $0x3f8] sm:$0xff]  ;;  %v546_v9 = vld [vmem:[#allocation4 + $0x3f0] sm:$0xff] }
  0xa0   : > { %3061 = vmatpush3.msra.mxu1 %v457_v43  ;;  %3027 = vmatprep.subr.mxu0 %v440_v44  ;;  %v376_v2 = vld [vmem:[%s4383_s27] sm:$0xff]  ;;  %v499_v6 = vld [vmem:[#allocation4 + $0x278] sm:$0xff]  ;;  %v498_v10 = vld [vmem:[#allocation4 + $0x270] sm:$0xff] }
  0xa1   : > { %3062 = vmatprep.subr.mxu1 %v472_v45  ;;  %3028 = vmatpush3.msra.mxu0 %v424_v46  ;;  %v531_v7 = vld [vmem:[#allocation4 + $0x378] sm:$0xff]  ;;  %v530_v11 = vld [vmem:[#allocation4 + $0x370] sm:$0xff]  ;;  %v513_v12 = vld [vmem:[#allocation4 + $0x2e8] sm:$0xff] }
  0xa2   : > { %3063 = vmatpush3.msra.mxu1 %v456_v47  ;;  %3029 = vmatprep.subr.mxu0 %v439_v48  ;;  %v545_v13 = vld [vmem:[#allocation4 + $0x3e8] sm:$0xff]  ;;  %v512_v16 = vld [vmem:[#allocation4 + $0x2e0] sm:$0xff]  ;;  %v511_v20 = vld [vmem:[#allocation4 + $0x2d8] sm:$0xff] }
  0xa3   : > { %3064 = vmatprep.subr.mxu1 %v471_v49  ;;  %3030 = vmatpush3.msra.mxu0 %v423_v50  ;;  %v497_v14 = vld [vmem:[#allocation4 + $0x268] sm:$0xff]  ;;  %v544_v17 = vld [vmem:[#allocation4 + $0x3e0] sm:$0xff]  ;;  %v543_v21 = vld [vmem:[#allocation4 + $0x3d8] sm:$0xff] }
  0xa4   : > { %3065 = vmatpush3.msra.mxu1 %v455_v51  ;;  %3031 = vmatprep.subr.mxu0 %v438_v52  ;;  %v529_v15 = vld [vmem:[#allocation4 + $0x368] sm:$0xff]  ;;  %v496_v18 = vld [vmem:[#allocation4 + $0x260] sm:$0xff]  ;;  %v495_v22 = vld [vmem:[#allocation4 + $0x258] sm:$0xff] }
  0xa5   : > { %3066 = vmatprep.subr.mxu1 %v470_v53  ;;  %3032 = vmatpush3.msra.mxu0 %v422_v54  ;;  %v528_v19 = vld [vmem:[#allocation4 + $0x360] sm:$0xff]  ;;  %v527_v23 = vld [vmem:[#allocation4 + $0x358] sm:$0xff]  ;;  %v510_v24 = vld [vmem:[#allocation4 + $0x2d0] sm:$0xff] }
  0xa6   : > { %3067 = vmatpush3.msra.mxu1 %v454_v55  ;;  %3033 = vmatprep.subr.mxu0 %v437_v56  ;;  %v542_v25 = vld [vmem:[#allocation4 + $0x3d0] sm:$0xff]  ;;  %v509_v28 = vld [vmem:[#allocation4 + $0x2c8] sm:$0xff]  ;;  %v508_v32 = vld [vmem:[#allocation4 + $0x2c0] sm:$0xff] }
  0xa7   : > { %3068 = vmatprep.subr.mxu1 %v469_v57  ;;  %3034 = vmatpush3.msra.mxu0 %v421_v58  ;;  %v494_v26 = vld [vmem:[#allocation4 + $0x250] sm:$0xff]  ;;  %v541_v29 = vld [vmem:[#allocation4 + $0x3c8] sm:$0xff]  ;;  %v540_v33 = vld [vmem:[#allocation4 + $0x3c0] sm:$0xff] }
  0xa8   : > { %3069 = vmatpush3.msra.mxu1 %v453_v59  ;;  %3035 = vmatprep.subr.mxu0 %v436_v60  ;;  %v526_v27 = vld [vmem:[#allocation4 + $0x350] sm:$0xff]  ;;  %v493_v30 = vld [vmem:[#allocation4 + $0x248] sm:$0xff]  ;;  %v492_v34 = vld [vmem:[#allocation4 + $0x240] sm:$0xff] }
  0xa9   : > { %3070 = vmatprep.subr.mxu1 %v468_v61  ;;  %3036 = vmatpush3.msra.mxu0 %v420_v62  ;;  %v525_v31 = vld [vmem:[#allocation4 + $0x348] sm:$0xff]  ;;  %v524_v35 = vld [vmem:[#allocation4 + $0x340] sm:$0xff]  ;;  %v507_v36 = vld [vmem:[#allocation4 + $0x2b8] sm:$0xff] }
  0xaa   : > { %1193 = vmatprep.mubr.f32.mxu0 %v377_v63  ;;  %3071 = vmatpush3.msra.mxu1 %v452_v0  ;;  %v539_v37 = vld [vmem:[#allocation4 + $0x3b8] sm:$0xff]  ;;  %v506_v40 = vld [vmem:[#allocation4 + $0x2b0] sm:$0xff]  ;;  %v505_v44 = vld [vmem:[#allocation4 + $0x2a8] sm:$0xff] }
  0xab   : > { %1263 = vmatprep.mubr.f32.mxu1 %v379_v1  ;;  %1194 = vmatmul.mubr.f32.vlgmr.msra.gmra.mxu0 %v376_v2  ;;  %v491_v38 = vld [vmem:[#allocation4 + $0x238] sm:$0xff]  ;;  %v538_v41 = vld [vmem:[#allocation4 + $0x3b0] sm:$0xff]  ;;  %v537_v45 = vld [vmem:[#allocation4 + $0x3a8] sm:$0xff] }
  0xac   : > { %1264 = vmatmul.mubr.f32.vlgmr.msra.gmra.mxu1 %v378_v3  ;;  %3075 = vmatprep.subr.mxu0 %v515_v4  ;;  %v523_v39 = vld [vmem:[#allocation4 + $0x338] sm:$0xff]  ;;  %v490_v42 = vld [vmem:[#allocation4 + $0x230] sm:$0xff]  ;;  %v489_v46 = vld [vmem:[#allocation4 + $0x228] sm:$0xff] }
  0xad   : > { %3110 = vmatprep.subr.mxu1 %v547_v5  ;;  %3076 = vmatpush3.msra.mxu0 %v499_v6  ;;  %v522_v43 = vld [vmem:[#allocation4 + $0x330] sm:$0xff]  ;;  %v521_v47 = vld [vmem:[#allocation4 + $0x328] sm:$0xff]  ;;  %v504_v48 = vld [vmem:[#allocation4 + $0x2a0] sm:$0xff] }
  0xae   : > { %3111 = vmatpush3.msra.mxu1 %v531_v7  ;;  %3077 = vmatprep.subr.mxu0 %v514_v8  ;;  %v536_v49 = vld [vmem:[#allocation4 + $0x3a0] sm:$0xff]  ;;  %v503_v52 = vld [vmem:[#allocation4 + $0x298] sm:$0xff]  ;;  %v502_v56 = vld [vmem:[#allocation4 + $0x290] sm:$0xff] }
  0xaf   : > { %3112 = vmatprep.subr.mxu1 %v546_v9  ;;  %3078 = vmatpush3.msra.mxu0 %v498_v10  ;;  %v488_v50 = vld [vmem:[#allocation4 + $0x220] sm:$0xff]  ;;  %v535_v53 = vld [vmem:[#allocation4 + $0x398] sm:$0xff]  ;;  %v534_v57 = vld [vmem:[#allocation4 + $0x390] sm:$0xff] }
  0xb0   : > { %3113 = vmatpush3.msra.mxu1 %v530_v11  ;;  %3079 = vmatprep.subr.mxu0 %v513_v12  ;;  %v520_v51 = vld [vmem:[#allocation4 + $0x320] sm:$0xff]  ;;  %v487_v54 = vld [vmem:[#allocation4 + $0x218] sm:$0xff]  ;;  %v486_v58 = vld [vmem:[#allocation4 + $0x210] sm:$0xff] }
  0xb1   : > { %3114 = vmatprep.subr.mxu1 %v545_v13  ;;  %3080 = vmatpush3.msra.mxu0 %v497_v14  ;;  %v519_v55 = vld [vmem:[#allocation4 + $0x318] sm:$0xff]  ;;  %v518_v59 = vld [vmem:[#allocation4 + $0x310] sm:$0xff]  ;;  %v501_v60 = vld [vmem:[#allocation4 + $0x288] sm:$0xff] }
  0xb2   : > { %3115 = vmatpush3.msra.mxu1 %v529_v15  ;;  %3081 = vmatprep.subr.mxu0 %v512_v16  ;;  %v533_v61 = vld [vmem:[#allocation4 + $0x388] sm:$0xff]  ;;  %v500_v0 = vld [vmem:[#allocation4 + $0x280] sm:$0xff]  ;;  %v383_v5 = vld [vmem:[%s4383_s27 + $0x38] sm:$0xff] }
  0xb3   : > { %3116 = vmatprep.subr.mxu1 %v544_v17  ;;  %3082 = vmatpush3.msra.mxu0 %v496_v18  ;;  %v485_v62 = vld [vmem:[#allocation4 + $0x208] sm:$0xff]  ;;  %v532_v1 = vld [vmem:[#allocation4 + $0x380] sm:$0xff]  ;;  %v382_v7 = vld [vmem:[%s4383_s27 + $0x30] sm:$0xff] }
  0xb4   : > { %3117 = vmatpush3.msra.mxu1 %v528_v19  ;;  %3083 = vmatprep.subr.mxu0 %v511_v20  ;;  %v517_v63 = vld [vmem:[#allocation4 + $0x308] sm:$0xff]  ;;  %v484_v2 = vld [vmem:[#allocation4 + $0x200] sm:$0xff]  ;;  %v579_v8 = vld [vmem:[#allocation4 + $0x4f8] sm:$0xff] }
  0xb5   : > { %3118 = vmatprep.subr.mxu1 %v543_v21  ;;  %3084 = vmatpush3.msra.mxu0 %v495_v22  ;;  %v381_v3 = vld [vmem:[%s4383_s27 + $0x28] sm:$0xff]  ;;  %v516_v4 = vld [vmem:[#allocation4 + $0x300] sm:$0xff]  ;;  %v611_v9 = vld [vmem:[#allocation4 + $0x5f8] sm:$0xff] }
  0xb6   : > { %3119 = vmatpush3.msra.mxu1 %v527_v23  ;;  %3085 = vmatprep.subr.mxu0 %v510_v24  ;;  %v380_v6 = vld [vmem:[%s4383_s27 + $0x20] sm:$0xff]  ;;  %v563_v10 = vld [vmem:[#allocation4 + $0x478] sm:$0xff]  ;;  %v578_v12 = vld [vmem:[#allocation4 + $0x4f0] sm:$0xff] }
  0xb7   : > { %3120 = vmatprep.subr.mxu1 %v542_v25  ;;  %3086 = vmatpush3.msra.mxu0 %v494_v26  ;;  %v595_v11 = vld [vmem:[#allocation4 + $0x578] sm:$0xff]  ;;  %v610_v13 = vld [vmem:[#allocation4 + $0x5f0] sm:$0xff]  ;;  %v577_v16 = vld [vmem:[#allocation4 + $0x4e8] sm:$0xff] }
  0xb8   : > { %3121 = vmatpush3.msra.mxu1 %v526_v27  ;;  %3087 = vmatprep.subr.mxu0 %v509_v28  ;;  %v562_v14 = vld [vmem:[#allocation4 + $0x470] sm:$0xff]  ;;  %v609_v17 = vld [vmem:[#allocation4 + $0x5e8] sm:$0xff]  ;;  %v576_v20 = vld [vmem:[#allocation4 + $0x4e0] sm:$0xff] }
  0xb9   : > { %3122 = vmatprep.subr.mxu1 %v541_v29  ;;  %3088 = vmatpush3.msra.mxu0 %v493_v30  ;;  %v594_v15 = vld [vmem:[#allocation4 + $0x570] sm:$0xff]  ;;  %v561_v18 = vld [vmem:[#allocation4 + $0x468] sm:$0xff]  ;;  %v608_v21 = vld [vmem:[#allocation4 + $0x5e0] sm:$0xff] }
  0xba   : > { %3123 = vmatpush3.msra.mxu1 %v525_v31  ;;  %3089 = vmatprep.subr.mxu0 %v508_v32  ;;  %v593_v19 = vld [vmem:[#allocation4 + $0x568] sm:$0xff]  ;;  %v560_v22 = vld [vmem:[#allocation4 + $0x460] sm:$0xff]  ;;  %v575_v24 = vld [vmem:[#allocation4 + $0x4d8] sm:$0xff] }
  0xbb   : > { %3124 = vmatprep.subr.mxu1 %v540_v33  ;;  %3090 = vmatpush3.msra.mxu0 %v492_v34  ;;  %v592_v23 = vld [vmem:[#allocation4 + $0x560] sm:$0xff]  ;;  %v607_v25 = vld [vmem:[#allocation4 + $0x5d8] sm:$0xff]  ;;  %v574_v28 = vld [vmem:[#allocation4 + $0x4d0] sm:$0xff] }
  0xbc   : > { %3125 = vmatpush3.msra.mxu1 %v524_v35  ;;  %3091 = vmatprep.subr.mxu0 %v507_v36  ;;  %v559_v26 = vld [vmem:[#allocation4 + $0x458] sm:$0xff]  ;;  %v606_v29 = vld [vmem:[#allocation4 + $0x5d0] sm:$0xff]  ;;  %v573_v32 = vld [vmem:[#allocation4 + $0x4c8] sm:$0xff] }
  0xbd   : > { %3126 = vmatprep.subr.mxu1 %v539_v37  ;;  %3092 = vmatpush3.msra.mxu0 %v491_v38  ;;  %v591_v27 = vld [vmem:[#allocation4 + $0x558] sm:$0xff]  ;;  %v558_v30 = vld [vmem:[#allocation4 + $0x450] sm:$0xff]  ;;  %v605_v33 = vld [vmem:[#allocation4 + $0x5c8] sm:$0xff] }
  0xbe   : > { %3127 = vmatpush3.msra.mxu1 %v523_v39  ;;  %3093 = vmatprep.subr.mxu0 %v506_v40  ;;  %v590_v31 = vld [vmem:[#allocation4 + $0x550] sm:$0xff]  ;;  %v557_v34 = vld [vmem:[#allocation4 + $0x448] sm:$0xff]  ;;  %v572_v36 = vld [vmem:[#allocation4 + $0x4c0] sm:$0xff] }
  0xbf   : > { %3128 = vmatprep.subr.mxu1 %v538_v41  ;;  %3094 = vmatpush3.msra.mxu0 %v490_v42  ;;  %v589_v35 = vld [vmem:[#allocation4 + $0x548] sm:$0xff]  ;;  %v604_v37 = vld [vmem:[#allocation4 + $0x5c0] sm:$0xff]  ;;  %v571_v40 = vld [vmem:[#allocation4 + $0x4b8] sm:$0xff] }
  0xc0   : > { %3129 = vmatpush3.msra.mxu1 %v522_v43  ;;  %3095 = vmatprep.subr.mxu0 %v505_v44  ;;  %v556_v38 = vld [vmem:[#allocation4 + $0x440] sm:$0xff]  ;;  %v603_v41 = vld [vmem:[#allocation4 + $0x5b8] sm:$0xff]  ;;  %v570_v44 = vld [vmem:[#allocation4 + $0x4b0] sm:$0xff] }
  0xc1   : > { %3130 = vmatprep.subr.mxu1 %v537_v45  ;;  %3096 = vmatpush3.msra.mxu0 %v489_v46  ;;  %v588_v39 = vld [vmem:[#allocation4 + $0x540] sm:$0xff]  ;;  %v555_v42 = vld [vmem:[#allocation4 + $0x438] sm:$0xff]  ;;  %v602_v45 = vld [vmem:[#allocation4 + $0x5b0] sm:$0xff] }
  0xc2   : > { %3131 = vmatpush3.msra.mxu1 %v521_v47  ;;  %3097 = vmatprep.subr.mxu0 %v504_v48  ;;  %v587_v43 = vld [vmem:[#allocation4 + $0x538] sm:$0xff]  ;;  %v554_v46 = vld [vmem:[#allocation4 + $0x430] sm:$0xff]  ;;  %v569_v48 = vld [vmem:[#allocation4 + $0x4a8] sm:$0xff] }
  0xc3   : > { %3132 = vmatprep.subr.mxu1 %v536_v49  ;;  %3098 = vmatpush3.msra.mxu0 %v488_v50  ;;  %v586_v47 = vld [vmem:[#allocation4 + $0x530] sm:$0xff]  ;;  %v601_v49 = vld [vmem:[#allocation4 + $0x5a8] sm:$0xff] }
  0xc4   : > { %3133 = vmatpush3.msra.mxu1 %v520_v51  ;;  %3099 = vmatprep.subr.mxu0 %v503_v52  ;;  %v553_v50 = vld [vmem:[#allocation4 + $0x428] sm:$0xff]  ;;  %v568_v52 = vld [vmem:[#allocation4 + $0x4a0] sm:$0xff] }
  0xc5   : > { %3134 = vmatprep.subr.mxu1 %v535_v53  ;;  %3100 = vmatpush3.msra.mxu0 %v487_v54  ;;  %v585_v51 = vld [vmem:[#allocation4 + $0x528] sm:$0xff]  ;;  %v600_v53 = vld [vmem:[#allocation4 + $0x5a0] sm:$0xff] }
  0xc6   : > { %3135 = vmatpush3.msra.mxu1 %v519_v55  ;;  %3101 = vmatprep.subr.mxu0 %v502_v56  ;;  %v552_v54 = vld [vmem:[#allocation4 + $0x420] sm:$0xff]  ;;  %v567_v56 = vld [vmem:[#allocation4 + $0x498] sm:$0xff] }
  0xc7   : > { %3136 = vmatprep.subr.mxu1 %v534_v57  ;;  %3102 = vmatpush3.msra.mxu0 %v486_v58  ;;  %v584_v55 = vld [vmem:[#allocation4 + $0x520] sm:$0xff]  ;;  %v599_v57 = vld [vmem:[#allocation4 + $0x598] sm:$0xff] }
  0xc8   : > { %3137 = vmatpush3.msra.mxu1 %v518_v59  ;;  %3103 = vmatprep.subr.mxu0 %v501_v60  ;;  %v551_v58 = vld [vmem:[#allocation4 + $0x418] sm:$0xff]  ;;  %v566_v60 = vld [vmem:[#allocation4 + $0x490] sm:$0xff] }
  0xc9   : > { %3138 = vmatprep.subr.mxu1 %v533_v61  ;;  %3104 = vmatpush3.msra.mxu0 %v485_v62  ;;  %v583_v59 = vld [vmem:[#allocation4 + $0x518] sm:$0xff]  ;;  %v598_v61 = vld [vmem:[#allocation4 + $0x590] sm:$0xff] }
  0xca   : > { %3139 = vmatpush3.msra.mxu1 %v517_v63  ;;  %3105 = vmatprep.subr.mxu0 %v500_v0  ;;  %v550_v62 = vld [vmem:[#allocation4 + $0x410] sm:$0xff]  ;;  %v565_v0 = vld [vmem:[#allocation4 + $0x488] sm:$0xff] }
  0xcb   : > { %3140 = vmatprep.subr.mxu1 %v532_v1  ;;  %3106 = vmatpush3.msra.mxu0 %v484_v2  ;;  %v582_v63 = vld [vmem:[#allocation4 + $0x510] sm:$0xff]  ;;  %v597_v1 = vld [vmem:[#allocation4 + $0x588] sm:$0xff] }
  0xcc   : > { %1333 = vmatprep.mubr.f32.mxu0 %v381_v3  ;;  %3141 = vmatpush3.msra.mxu1 %v516_v4  ;;  %v549_v2 = vld [vmem:[#allocation4 + $0x408] sm:$0xff]  ;;  %v564_v4 = vld [vmem:[#allocation4 + $0x480] sm:$0xff] }
  0xcd   : > { %1403 = vmatprep.mubr.f32.mxu1 %v383_v5  ;;  %1334 = vmatmul.mubr.f32.vlgmr.msra.gmra.mxu0 %v380_v6  ;;  %v581_v3 = vld [vmem:[#allocation4 + $0x508] sm:$0xff]  ;;  %v596_v5 = vld [vmem:[#allocation4 + $0x580] sm:$0xff] }
  0xce   : > { %1404 = vmatmul.mubr.f32.vlgmr.msra.gmra.mxu1 %v382_v7  ;;  %3145 = vmatprep.subr.mxu0 %v579_v8  ;;  %v548_v6 = vld [vmem:[#allocation4 + $0x400] sm:$0xff]  ;;  %v385_v7 = vld [vmem:[%s4383_s27 + $0x48] sm:$0xff] }
  0xcf   : > { %3180 = vmatprep.subr.mxu1 %v611_v9  ;;  %3146 = vmatpush3.msra.mxu0 %v563_v10  ;;  %v580_v8 = vld [vmem:[#allocation4 + $0x500] sm:$0xff]  ;;  %v387_v9 = vld [vmem:[%s4383_s27 + $0x58] sm:$0xff] }
  0xd0   : > { %3181 = vmatpush3.msra.mxu1 %v595_v11  ;;  %3147 = vmatprep.subr.mxu0 %v578_v12  ;;  %v384_v10 = vld [vmem:[%s4383_s27 + $0x40] sm:$0xff]  ;;  %v386_v11 = vld [vmem:[%s4383_s27 + $0x50] sm:$0xff]  ;;  %v643_v12 = vld [vmem:[#allocation4 + $0x6f8] sm:$0xff] }
  0xd1   : > { %3182 = vmatprep.subr.mxu1 %v610_v13  ;;  %3148 = vmatpush3.msra.mxu0 %v562_v14  ;;  %v675_v13 = vld [vmem:[#allocation4 + $0x7f8] sm:$0xff] }
  0xd2   : > { %3183 = vmatpush3.msra.mxu1 %v594_v15  ;;  %3149 = vmatprep.subr.mxu0 %v577_v16  ;;  %v627_v14 = vld [vmem:[#allocation4 + $0x678] sm:$0xff]  ;;  %v642_v16 = vld [vmem:[#allocation4 + $0x6f0] sm:$0xff] }
  0xd3   : > { %3184 = vmatprep.subr.mxu1 %v609_v17  ;;  %3150 = vmatpush3.msra.mxu0 %v561_v18  ;;  %v659_v15 = vld [vmem:[#allocation4 + $0x778] sm:$0xff]  ;;  %v674_v17 = vld [vmem:[#allocation4 + $0x7f0] sm:$0xff] }
  0xd4   : > { %3185 = vmatpush3.msra.mxu1 %v593_v19  ;;  %3151 = vmatprep.subr.mxu0 %v576_v20  ;;  %v626_v18 = vld [vmem:[#allocation4 + $0x670] sm:$0xff]  ;;  %v641_v20 = vld [vmem:[#allocation4 + $0x6e8] sm:$0xff] }
  0xd5   : > { %3186 = vmatprep.subr.mxu1 %v608_v21  ;;  %3152 = vmatpush3.msra.mxu0 %v560_v22  ;;  %v658_v19 = vld [vmem:[#allocation4 + $0x770] sm:$0xff]  ;;  %v673_v21 = vld [vmem:[#allocation4 + $0x7e8] sm:$0xff] }
  0xd6   : > { %3187 = vmatpush3.msra.mxu1 %v592_v23  ;;  %3153 = vmatprep.subr.mxu0 %v575_v24  ;;  %v625_v22 = vld [vmem:[#allocation4 + $0x668] sm:$0xff]  ;;  %v640_v24 = vld [vmem:[#allocation4 + $0x6e0] sm:$0xff] }
  0xd7   : > { %3188 = vmatprep.subr.mxu1 %v607_v25  ;;  %3154 = vmatpush3.msra.mxu0 %v559_v26  ;;  %v657_v23 = vld [vmem:[#allocation4 + $0x768] sm:$0xff]  ;;  %v672_v25 = vld [vmem:[#allocation4 + $0x7e0] sm:$0xff] }
  0xd8   : > { %3189 = vmatpush3.msra.mxu1 %v591_v27  ;;  %3155 = vmatprep.subr.mxu0 %v574_v28  ;;  %v624_v26 = vld [vmem:[#allocation4 + $0x660] sm:$0xff]  ;;  %v639_v28 = vld [vmem:[#allocation4 + $0x6d8] sm:$0xff] }
  0xd9   : > { %3190 = vmatprep.subr.mxu1 %v606_v29  ;;  %3156 = vmatpush3.msra.mxu0 %v558_v30  ;;  %v656_v27 = vld [vmem:[#allocation4 + $0x760] sm:$0xff]  ;;  %v671_v29 = vld [vmem:[#allocation4 + $0x7d8] sm:$0xff] }
  0xda   : > { %3191 = vmatpush3.msra.mxu1 %v590_v31  ;;  %3157 = vmatprep.subr.mxu0 %v573_v32  ;;  %v623_v30 = vld [vmem:[#allocation4 + $0x658] sm:$0xff]  ;;  %v638_v32 = vld [vmem:[#allocation4 + $0x6d0] sm:$0xff] }
  0xdb   : > { %3192 = vmatprep.subr.mxu1 %v605_v33  ;;  %3158 = vmatpush3.msra.mxu0 %v557_v34  ;;  %v655_v31 = vld [vmem:[#allocation4 + $0x758] sm:$0xff]  ;;  %v670_v33 = vld [vmem:[#allocation4 + $0x7d0] sm:$0xff] }
  0xdc   : > { %3193 = vmatpush3.msra.mxu1 %v589_v35  ;;  %3159 = vmatprep.subr.mxu0 %v572_v36  ;;  %v622_v34 = vld [vmem:[#allocation4 + $0x650] sm:$0xff]  ;;  %v637_v36 = vld [vmem:[#allocation4 + $0x6c8] sm:$0xff] }
  0xdd   : > { %3194 = vmatprep.subr.mxu1 %v604_v37  ;;  %3160 = vmatpush3.msra.mxu0 %v556_v38  ;;  %v654_v35 = vld [vmem:[#allocation4 + $0x750] sm:$0xff]  ;;  %v669_v37 = vld [vmem:[#allocation4 + $0x7c8] sm:$0xff] }
  0xde   : > { %3195 = vmatpush3.msra.mxu1 %v588_v39  ;;  %3161 = vmatprep.subr.mxu0 %v571_v40  ;;  %v621_v38 = vld [vmem:[#allocation4 + $0x648] sm:$0xff]  ;;  %v636_v40 = vld [vmem:[#allocation4 + $0x6c0] sm:$0xff] }
  0xdf   : > { %3196 = vmatprep.subr.mxu1 %v603_v41  ;;  %3162 = vmatpush3.msra.mxu0 %v555_v42  ;;  %v653_v39 = vld [vmem:[#allocation4 + $0x748] sm:$0xff]  ;;  %v668_v41 = vld [vmem:[#allocation4 + $0x7c0] sm:$0xff] }
  0xe0   : > { %3197 = vmatpush3.msra.mxu1 %v587_v43  ;;  %3163 = vmatprep.subr.mxu0 %v570_v44  ;;  %v620_v42 = vld [vmem:[#allocation4 + $0x640] sm:$0xff]  ;;  %v635_v44 = vld [vmem:[#allocation4 + $0x6b8] sm:$0xff] }
  0xe1   : > { %3198 = vmatprep.subr.mxu1 %v602_v45  ;;  %3164 = vmatpush3.msra.mxu0 %v554_v46  ;;  %v652_v43 = vld [vmem:[#allocation4 + $0x740] sm:$0xff]  ;;  %v667_v45 = vld [vmem:[#allocation4 + $0x7b8] sm:$0xff] }
  0xe2   : > { %3199 = vmatpush3.msra.mxu1 %v586_v47  ;;  %3165 = vmatprep.subr.mxu0 %v569_v48  ;;  %v619_v46 = vld [vmem:[#allocation4 + $0x638] sm:$0xff]  ;;  %v634_v48 = vld [vmem:[#allocation4 + $0x6b0] sm:$0xff] }
  0xe3   : > { %3200 = vmatprep.subr.mxu1 %v601_v49  ;;  %3166 = vmatpush3.msra.mxu0 %v553_v50  ;;  %v651_v47 = vld [vmem:[#allocation4 + $0x738] sm:$0xff]  ;;  %v666_v49 = vld [vmem:[#allocation4 + $0x7b0] sm:$0xff] }
  0xe4   : > { %3201 = vmatpush3.msra.mxu1 %v585_v51  ;;  %3167 = vmatprep.subr.mxu0 %v568_v52  ;;  %v618_v50 = vld [vmem:[#allocation4 + $0x630] sm:$0xff]  ;;  %v633_v52 = vld [vmem:[#allocation4 + $0x6a8] sm:$0xff] }
  0xe5   : > { %3202 = vmatprep.subr.mxu1 %v600_v53  ;;  %3168 = vmatpush3.msra.mxu0 %v552_v54  ;;  %v650_v51 = vld [vmem:[#allocation4 + $0x730] sm:$0xff]  ;;  %v665_v53 = vld [vmem:[#allocation4 + $0x7a8] sm:$0xff] }
  0xe6   : > { %3203 = vmatpush3.msra.mxu1 %v584_v55  ;;  %3169 = vmatprep.subr.mxu0 %v567_v56  ;;  %v617_v54 = vld [vmem:[#allocation4 + $0x628] sm:$0xff]  ;;  %v632_v56 = vld [vmem:[#allocation4 + $0x6a0] sm:$0xff] }
  0xe7   : > { %3204 = vmatprep.subr.mxu1 %v599_v57  ;;  %3170 = vmatpush3.msra.mxu0 %v551_v58  ;;  %v649_v55 = vld [vmem:[#allocation4 + $0x728] sm:$0xff]  ;;  %v664_v57 = vld [vmem:[#allocation4 + $0x7a0] sm:$0xff] }
  0xe8   : > { %3205 = vmatpush3.msra.mxu1 %v583_v59  ;;  %3171 = vmatprep.subr.mxu0 %v566_v60  ;;  %v616_v58 = vld [vmem:[#allocation4 + $0x620] sm:$0xff]  ;;  %v631_v60 = vld [vmem:[#allocation4 + $0x698] sm:$0xff] }
  0xe9   : > { %3206 = vmatprep.subr.mxu1 %v598_v61  ;;  %3172 = vmatpush3.msra.mxu0 %v550_v62  ;;  %v648_v59 = vld [vmem:[#allocation4 + $0x720] sm:$0xff]  ;;  %v663_v61 = vld [vmem:[#allocation4 + $0x798] sm:$0xff] }
  0xea   : > { %3207 = vmatpush3.msra.mxu1 %v582_v63  ;;  %3173 = vmatprep.subr.mxu0 %v565_v0  ;;  %v615_v62 = vld [vmem:[#allocation4 + $0x618] sm:$0xff]  ;;  %v630_v0 = vld [vmem:[#allocation4 + $0x690] sm:$0xff] }
  0xeb   : > { %3208 = vmatprep.subr.mxu1 %v597_v1  ;;  %3174 = vmatpush3.msra.mxu0 %v549_v2  ;;  %v647_v63 = vld [vmem:[#allocation4 + $0x718] sm:$0xff]  ;;  %v662_v1 = vld [vmem:[#allocation4 + $0x790] sm:$0xff] }
  0xec   : > { %3209 = vmatpush3.msra.mxu1 %v581_v3  ;;  %3175 = vmatprep.subr.mxu0 %v564_v4  ;;  %v614_v2 = vld [vmem:[#allocation4 + $0x610] sm:$0xff]  ;;  %v629_v4 = vld [vmem:[#allocation4 + $0x688] sm:$0xff] }
  0xed   : > { %3210 = vmatprep.subr.mxu1 %v596_v5  ;;  %3176 = vmatpush3.msra.mxu0 %v548_v6  ;;  %v646_v3 = vld [vmem:[#allocation4 + $0x710] sm:$0xff]  ;;  %v661_v5 = vld [vmem:[#allocation4 + $0x788] sm:$0xff] }
  0xee   : > { %1473 = vmatprep.mubr.f32.mxu0 %v385_v7  ;;  %3211 = vmatpush3.msra.mxu1 %v580_v8  ;;  %v613_v6 = vld [vmem:[#allocation4 + $0x608] sm:$0xff]  ;;  %v628_v8 = vld [vmem:[#allocation4 + $0x680] sm:$0xff] }
  0xef   : > { %1543 = vmatprep.mubr.f32.mxu1 %v387_v9  ;;  %1474 = vmatmul.mubr.f32.vlgmr.msra.gmra.mxu0 %v384_v10  ;;  %v645_v7 = vld [vmem:[#allocation4 + $0x708] sm:$0xff]  ;;  %v660_v9 = vld [vmem:[#allocation4 + $0x780] sm:$0xff] }
  0xf0   : > { %1544 = vmatmul.mubr.f32.vlgmr.msra.gmra.mxu1 %v386_v11  ;;  %3215 = vmatprep.subr.mxu0 %v643_v12  ;;  %v612_v10 = vld [vmem:[#allocation4 + $0x600] sm:$0xff]  ;;  %v389_v11 = vld [vmem:[%s4383_s27 + $0x68] sm:$0xff] }
  0xf1   : > { %3250 = vmatprep.subr.mxu1 %v675_v13  ;;  %3216 = vmatpush3.msra.mxu0 %v627_v14  ;;  %v644_v12 = vld [vmem:[#allocation4 + $0x700] sm:$0xff]  ;;  %v391_v13 = vld [vmem:[%s4383_s27 + $0x78] sm:$0xff] }
  0xf2   : > { %3251 = vmatpush3.msra.mxu1 %v659_v15  ;;  %3217 = vmatprep.subr.mxu0 %v642_v16  ;;  %v388_v14 = vld [vmem:[%s4383_s27 + $0x60] sm:$0xff]  ;;  %v390_v15 = vld [vmem:[%s4383_s27 + $0x70] sm:$0xff]  ;;  %v707_v16 = vld [vmem:[#allocation4 + $0x8f8] sm:$0xff] }
  0xf3   : > { %3252 = vmatprep.subr.mxu1 %v674_v17  ;;  %3218 = vmatpush3.msra.mxu0 %v626_v18  ;;  %v739_v17 = vld [vmem:[#allocation4 + $0x9f8] sm:$0xff] }
  0xf4   : > { %3253 = vmatpush3.msra.mxu1 %v658_v19  ;;  %3219 = vmatprep.subr.mxu0 %v641_v20  ;;  %v691_v18 = vld [vmem:[#allocation4 + $0x878] sm:$0xff]  ;;  %v706_v20 = vld [vmem:[#allocation4 + $0x8f0] sm:$0xff] }
  0xf5   : > { %3254 = vmatprep.subr.mxu1 %v673_v21  ;;  %3220 = vmatpush3.msra.mxu0 %v625_v22  ;;  %v723_v19 = vld [vmem:[#allocation4 + $0x978] sm:$0xff]  ;;  %v738_v21 = vld [vmem:[#allocation4 + $0x9f0] sm:$0xff] }
  0xf6   : > { %3255 = vmatpush3.msra.mxu1 %v657_v23  ;;  %3221 = vmatprep.subr.mxu0 %v640_v24  ;;  %v690_v22 = vld [vmem:[#allocation4 + $0x870] sm:$0xff]  ;;  %v705_v24 = vld [vmem:[#allocation4 + $0x8e8] sm:$0xff] }
  0xf7   : > { %3256 = vmatprep.subr.mxu1 %v672_v25  ;;  %3222 = vmatpush3.msra.mxu0 %v624_v26  ;;  %v722_v23 = vld [vmem:[#allocation4 + $0x970] sm:$0xff]  ;;  %v737_v25 = vld [vmem:[#allocation4 + $0x9e8] sm:$0xff] }
  0xf8   : > { %3257 = vmatpush3.msra.mxu1 %v656_v27  ;;  %3223 = vmatprep.subr.mxu0 %v639_v28  ;;  %v689_v26 = vld [vmem:[#allocation4 + $0x868] sm:$0xff]  ;;  %v704_v28 = vld [vmem:[#allocation4 + $0x8e0] sm:$0xff] }
  0xf9   : > { %3258 = vmatprep.subr.mxu1 %v671_v29  ;;  %3224 = vmatpush3.msra.mxu0 %v623_v30  ;;  %v721_v27 = vld [vmem:[#allocation4 + $0x968] sm:$0xff]  ;;  %v736_v29 = vld [vmem:[#allocation4 + $0x9e0] sm:$0xff] }
  0xfa   : > { %3259 = vmatpush3.msra.mxu1 %v655_v31  ;;  %3225 = vmatprep.subr.mxu0 %v638_v32  ;;  %v688_v30 = vld [vmem:[#allocation4 + $0x860] sm:$0xff]  ;;  %v703_v32 = vld [vmem:[#allocation4 + $0x8d8] sm:$0xff] }
  0xfb   : > { %3260 = vmatprep.subr.mxu1 %v670_v33  ;;  %3226 = vmatpush3.msra.mxu0 %v622_v34  ;;  %v720_v31 = vld [vmem:[#allocation4 + $0x960] sm:$0xff]  ;;  %v735_v33 = vld [vmem:[#allocation4 + $0x9d8] sm:$0xff] }
  0xfc   : > { %3261 = vmatpush3.msra.mxu1 %v654_v35  ;;  %3227 = vmatprep.subr.mxu0 %v637_v36  ;;  %v687_v34 = vld [vmem:[#allocation4 + $0x858] sm:$0xff]  ;;  %v702_v36 = vld [vmem:[#allocation4 + $0x8d0] sm:$0xff] }
  0xfd   : > { %3262 = vmatprep.subr.mxu1 %v669_v37  ;;  %3228 = vmatpush3.msra.mxu0 %v621_v38  ;;  %v719_v35 = vld [vmem:[#allocation4 + $0x958] sm:$0xff]  ;;  %v734_v37 = vld [vmem:[#allocation4 + $0x9d0] sm:$0xff] }
  0xfe   : > { %3263 = vmatpush3.msra.mxu1 %v653_v39  ;;  %3229 = vmatprep.subr.mxu0 %v636_v40  ;;  %v686_v38 = vld [vmem:[#allocation4 + $0x850] sm:$0xff]  ;;  %v701_v40 = vld [vmem:[#allocation4 + $0x8c8] sm:$0xff] }
  0xff   : > { %3264 = vmatprep.subr.mxu1 %v668_v41  ;;  %3230 = vmatpush3.msra.mxu0 %v620_v42  ;;  %v718_v39 = vld [vmem:[#allocation4 + $0x950] sm:$0xff]  ;;  %v733_v41 = vld [vmem:[#allocation4 + $0x9c8] sm:$0xff] }
 0x100   : > { %3265 = vmatpush3.msra.mxu1 %v652_v43  ;;  %3231 = vmatprep.subr.mxu0 %v635_v44  ;;  %v685_v42 = vld [vmem:[#allocation4 + $0x848] sm:$0xff]  ;;  %v700_v44 = vld [vmem:[#allocation4 + $0x8c0] sm:$0xff] }
 0x101   : > { %3266 = vmatprep.subr.mxu1 %v667_v45  ;;  %3232 = vmatpush3.msra.mxu0 %v619_v46  ;;  %v717_v43 = vld [vmem:[#allocation4 + $0x948] sm:$0xff]  ;;  %v732_v45 = vld [vmem:[#allocation4 + $0x9c0] sm:$0xff] }
 0x102   : > { %3267 = vmatpush3.msra.mxu1 %v651_v47  ;;  %3233 = vmatprep.subr.mxu0 %v634_v48  ;;  %v684_v46 = vld [vmem:[#allocation4 + $0x840] sm:$0xff]  ;;  %v699_v48 = vld [vmem:[#allocation4 + $0x8b8] sm:$0xff] }
 0x103   : > { %3268 = vmatprep.subr.mxu1 %v666_v49  ;;  %3234 = vmatpush3.msra.mxu0 %v618_v50  ;;  %v716_v47 = vld [vmem:[#allocation4 + $0x940] sm:$0xff]  ;;  %v731_v49 = vld [vmem:[#allocation4 + $0x9b8] sm:$0xff] }
 0x104   : > { %3269 = vmatpush3.msra.mxu1 %v650_v51  ;;  %3235 = vmatprep.subr.mxu0 %v633_v52  ;;  %v683_v50 = vld [vmem:[#allocation4 + $0x838] sm:$0xff]  ;;  %v698_v52 = vld [vmem:[#allocation4 + $0x8b0] sm:$0xff] }
 0x105   : > { %3270 = vmatprep.subr.mxu1 %v665_v53  ;;  %3236 = vmatpush3.msra.mxu0 %v617_v54  ;;  %v715_v51 = vld [vmem:[#allocation4 + $0x938] sm:$0xff]  ;;  %v730_v53 = vld [vmem:[#allocation4 + $0x9b0] sm:$0xff] }
 0x106   : > { %3271 = vmatpush3.msra.mxu1 %v649_v55  ;;  %3237 = vmatprep.subr.mxu0 %v632_v56  ;;  %v682_v54 = vld [vmem:[#allocation4 + $0x830] sm:$0xff]  ;;  %v697_v56 = vld [vmem:[#allocation4 + $0x8a8] sm:$0xff] }
 0x107   : > { %3272 = vmatprep.subr.mxu1 %v664_v57  ;;  %3238 = vmatpush3.msra.mxu0 %v616_v58  ;;  %v714_v55 = vld [vmem:[#allocation4 + $0x930] sm:$0xff]  ;;  %v729_v57 = vld [vmem:[#allocation4 + $0x9a8] sm:$0xff] }
 0x108   : > { %3273 = vmatpush3.msra.mxu1 %v648_v59  ;;  %3239 = vmatprep.subr.mxu0 %v631_v60  ;;  %v681_v58 = vld [vmem:[#allocation4 + $0x828] sm:$0xff]  ;;  %v696_v60 = vld [vmem:[#allocation4 + $0x8a0] sm:$0xff] }
 0x109   : > { %3274 = vmatprep.subr.mxu1 %v663_v61  ;;  %3240 = vmatpush3.msra.mxu0 %v615_v62  ;;  %v713_v59 = vld [vmem:[#allocation4 + $0x928] sm:$0xff]  ;;  %v728_v61 = vld [vmem:[#allocation4 + $0x9a0] sm:$0xff] }
 0x10a   : > { %3275 = vmatpush3.msra.mxu1 %v647_v63  ;;  %3241 = vmatprep.subr.mxu0 %v630_v0  ;;  %v680_v62 = vld [vmem:[#allocation4 + $0x820] sm:$0xff]  ;;  %v695_v0 = vld [vmem:[#allocation4 + $0x898] sm:$0xff] }
 0x10b   : > { %3276 = vmatprep.subr.mxu1 %v662_v1  ;;  %3242 = vmatpush3.msra.mxu0 %v614_v2  ;;  %v712_v63 = vld [vmem:[#allocation4 + $0x920] sm:$0xff]  ;;  %v727_v1 = vld [vmem:[#allocation4 + $0x998] sm:$0xff] }
 0x10c   : > { %3277 = vmatpush3.msra.mxu1 %v646_v3  ;;  %3243 = vmatprep.subr.mxu0 %v629_v4  ;;  %v679_v2 = vld [vmem:[#allocation4 + $0x818] sm:$0xff]  ;;  %v694_v4 = vld [vmem:[#allocation4 + $0x890] sm:$0xff] }
 0x10d   : > { %3278 = vmatprep.subr.mxu1 %v661_v5  ;;  %3244 = vmatpush3.msra.mxu0 %v613_v6  ;;  %v711_v3 = vld [vmem:[#allocation4 + $0x918] sm:$0xff]  ;;  %v726_v5 = vld [vmem:[#allocation4 + $0x990] sm:$0xff] }
 0x10e   : > { %3279 = vmatpush3.msra.mxu1 %v645_v7  ;;  %3245 = vmatprep.subr.mxu0 %v628_v8  ;;  %v678_v6 = vld [vmem:[#allocation4 + $0x810] sm:$0xff]  ;;  %v693_v8 = vld [vmem:[#allocation4 + $0x888] sm:$0xff] }
 0x10f   : > { %3280 = vmatprep.subr.mxu1 %v660_v9  ;;  %3246 = vmatpush3.msra.mxu0 %v612_v10  ;;  %v710_v7 = vld [vmem:[#allocation4 + $0x910] sm:$0xff]  ;;  %v725_v9 = vld [vmem:[#allocation4 + $0x988] sm:$0xff] }
 0x110   : > { %1613 = vmatprep.mubr.f32.mxu0 %v389_v11  ;;  %3281 = vmatpush3.msra.mxu1 %v644_v12  ;;  %v677_v10 = vld [vmem:[#allocation4 + $0x808] sm:$0xff]  ;;  %v692_v12 = vld [vmem:[#allocation4 + $0x880] sm:$0xff] }
 0x111   : > { %1683 = vmatprep.mubr.f32.mxu1 %v391_v13  ;;  %1614 = vmatmul.mubr.f32.vlgmr.msra.gmra.mxu0 %v388_v14  ;;  %v709_v11 = vld [vmem:[#allocation4 + $0x908] sm:$0xff]  ;;  %v724_v13 = vld [vmem:[#allocation4 + $0x980] sm:$0xff] }
 0x112   : > { %1684 = vmatmul.mubr.f32.vlgmr.msra.gmra.mxu1 %v390_v15  ;;  %3285 = vmatprep.subr.mxu0 %v707_v16  ;;  %v676_v14 = vld [vmem:[#allocation4 + $0x800] sm:$0xff]  ;;  %v393_v15 = vld [vmem:[%s4383_s27 + $0x88] sm:$0xff] }
 0x113   : > { %3320 = vmatprep.subr.mxu1 %v739_v17  ;;  %3286 = vmatpush3.msra.mxu0 %v691_v18  ;;  %v708_v16 = vld [vmem:[#allocation4 + $0x900] sm:$0xff]  ;;  %v395_v17 = vld [vmem:[%s4383_s27 + $0x98] sm:$0xff] }
 0x114   : > { %3321 = vmatpush3.msra.mxu1 %v723_v19  ;;  %3287 = vmatprep.subr.mxu0 %v706_v20  ;;  %v392_v18 = vld [vmem:[%s4383_s27 + $0x80] sm:$0xff]  ;;  %v394_v19 = vld [vmem:[%s4383_s27 + $0x90] sm:$0xff]  ;;  %v771_v20 = vld [vmem:[#allocation4 + $0xaf8] sm:$0xff] }
 0x115   : > { %3322 = vmatprep.subr.mxu1 %v738_v21  ;;  %3288 = vmatpush3.msra.mxu0 %v690_v22  ;;  %v803_v21 = vld [vmem:[#allocation4 + $0xbf8] sm:$0xff] }
 0x116   : > { %3323 = vmatpush3.msra.mxu1 %v722_v23  ;;  %3289 = vmatprep.subr.mxu0 %v705_v24  ;;  %v755_v22 = vld [vmem:[#allocation4 + $0xa78] sm:$0xff]  ;;  %v770_v24 = vld [vmem:[#allocation4 + $0xaf0] sm:$0xff] }
 0x117   : > { %3324 = vmatprep.subr.mxu1 %v737_v25  ;;  %3290 = vmatpush3.msra.mxu0 %v689_v26  ;;  %v787_v23 = vld [vmem:[#allocation4 + $0xb78] sm:$0xff]  ;;  %v802_v25 = vld [vmem:[#allocation4 + $0xbf0] sm:$0xff] }
 0x118   : > { %3325 = vmatpush3.msra.mxu1 %v721_v27  ;;  %3291 = vmatprep.subr.mxu0 %v704_v28  ;;  %v754_v26 = vld [vmem:[#allocation4 + $0xa70] sm:$0xff]  ;;  %v769_v28 = vld [vmem:[#allocation4 + $0xae8] sm:$0xff] }
 0x119   : > { %3326 = vmatprep.subr.mxu1 %v736_v29  ;;  %3292 = vmatpush3.msra.mxu0 %v688_v30  ;;  %v786_v27 = vld [vmem:[#allocation4 + $0xb70] sm:$0xff]  ;;  %v801_v29 = vld [vmem:[#allocation4 + $0xbe8] sm:$0xff] }
 0x11a   : > { %3327 = vmatpush3.msra.mxu1 %v720_v31  ;;  %3293 = vmatprep.subr.mxu0 %v703_v32  ;;  %v753_v30 = vld [vmem:[#allocation4 + $0xa68] sm:$0xff]  ;;  %v768_v32 = vld [vmem:[#allocation4 + $0xae0] sm:$0xff] }
 0x11b   : > { %3328 = vmatprep.subr.mxu1 %v735_v33  ;;  %3294 = vmatpush3.msra.mxu0 %v687_v34  ;;  %v785_v31 = vld [vmem:[#allocation4 + $0xb68] sm:$0xff]  ;;  %v800_v33 = vld [vmem:[#allocation4 + $0xbe0] sm:$0xff] }
 0x11c   : > { %3329 = vmatpush3.msra.mxu1 %v719_v35  ;;  %3295 = vmatprep.subr.mxu0 %v702_v36  ;;  %v752_v34 = vld [vmem:[#allocation4 + $0xa60] sm:$0xff]  ;;  %v767_v36 = vld [vmem:[#allocation4 + $0xad8] sm:$0xff] }
 0x11d   : > { %3330 = vmatprep.subr.mxu1 %v734_v37  ;;  %3296 = vmatpush3.msra.mxu0 %v686_v38  ;;  %v784_v35 = vld [vmem:[#allocation4 + $0xb60] sm:$0xff]  ;;  %v799_v37 = vld [vmem:[#allocation4 + $0xbd8] sm:$0xff] }
 0x11e   : > { %3331 = vmatpush3.msra.mxu1 %v718_v39  ;;  %3297 = vmatprep.subr.mxu0 %v701_v40  ;;  %v751_v38 = vld [vmem:[#allocation4 + $0xa58] sm:$0xff]  ;;  %v766_v40 = vld [vmem:[#allocation4 + $0xad0] sm:$0xff] }
 0x11f   : > { %3332 = vmatprep.subr.mxu1 %v733_v41  ;;  %3298 = vmatpush3.msra.mxu0 %v685_v42  ;;  %v783_v39 = vld [vmem:[#allocation4 + $0xb58] sm:$0xff]  ;;  %v798_v41 = vld [vmem:[#allocation4 + $0xbd0] sm:$0xff] }
 0x120   : > { %3333 = vmatpush3.msra.mxu1 %v717_v43  ;;  %3299 = vmatprep.subr.mxu0 %v700_v44  ;;  %v750_v42 = vld [vmem:[#allocation4 + $0xa50] sm:$0xff]  ;;  %v765_v44 = vld [vmem:[#allocation4 + $0xac8] sm:$0xff] }
 0x121   : > { %3334 = vmatprep.subr.mxu1 %v732_v45  ;;  %3300 = vmatpush3.msra.mxu0 %v684_v46  ;;  %v782_v43 = vld [vmem:[#allocation4 + $0xb50] sm:$0xff]  ;;  %v797_v45 = vld [vmem:[#allocation4 + $0xbc8] sm:$0xff] }
 0x122   : > { %3335 = vmatpush3.msra.mxu1 %v716_v47  ;;  %3301 = vmatprep.subr.mxu0 %v699_v48  ;;  %v749_v46 = vld [vmem:[#allocation4 + $0xa48] sm:$0xff]  ;;  %v764_v48 = vld [vmem:[#allocation4 + $0xac0] sm:$0xff] }
 0x123   : > { %3336 = vmatprep.subr.mxu1 %v731_v49  ;;  %3302 = vmatpush3.msra.mxu0 %v683_v50  ;;  %v781_v47 = vld [vmem:[#allocation4 + $0xb48] sm:$0xff]  ;;  %v796_v49 = vld [vmem:[#allocation4 + $0xbc0] sm:$0xff] }
 0x124   : > { %3337 = vmatpush3.msra.mxu1 %v715_v51  ;;  %3303 = vmatprep.subr.mxu0 %v698_v52  ;;  %v748_v50 = vld [vmem:[#allocation4 + $0xa40] sm:$0xff]  ;;  %v763_v52 = vld [vmem:[#allocation4 + $0xab8] sm:$0xff] }
 0x125   : > { %3338 = vmatprep.subr.mxu1 %v730_v53  ;;  %3304 = vmatpush3.msra.mxu0 %v682_v54  ;;  %v780_v51 = vld [vmem:[#allocation4 + $0xb40] sm:$0xff]  ;;  %v795_v53 = vld [vmem:[#allocation4 + $0xbb8] sm:$0xff] }
 0x126   : > { %3339 = vmatpush3.msra.mxu1 %v714_v55  ;;  %3305 = vmatprep.subr.mxu0 %v697_v56  ;;  %v747_v54 = vld [vmem:[#allocation4 + $0xa38] sm:$0xff]  ;;  %v762_v56 = vld [vmem:[#allocation4 + $0xab0] sm:$0xff] }
 0x127   : > { %3340 = vmatprep.subr.mxu1 %v729_v57  ;;  %3306 = vmatpush3.msra.mxu0 %v681_v58  ;;  %v779_v55 = vld [vmem:[#allocation4 + $0xb38] sm:$0xff]  ;;  %v794_v57 = vld [vmem:[#allocation4 + $0xbb0] sm:$0xff] }
 0x128   : > { %3341 = vmatpush3.msra.mxu1 %v713_v59  ;;  %3307 = vmatprep.subr.mxu0 %v696_v60  ;;  %v746_v58 = vld [vmem:[#allocation4 + $0xa30] sm:$0xff]  ;;  %v761_v60 = vld [vmem:[#allocation4 + $0xaa8] sm:$0xff] }
 0x129   : > { %3342 = vmatprep.subr.mxu1 %v728_v61  ;;  %3308 = vmatpush3.msra.mxu0 %v680_v62  ;;  %v778_v59 = vld [vmem:[#allocation4 + $0xb30] sm:$0xff]  ;;  %v793_v61 = vld [vmem:[#allocation4 + $0xba8] sm:$0xff] }
 0x12a   : > { %3343 = vmatpush3.msra.mxu1 %v712_v63  ;;  %3309 = vmatprep.subr.mxu0 %v695_v0  ;;  %v745_v62 = vld [vmem:[#allocation4 + $0xa28] sm:$0xff]  ;;  %v760_v0 = vld [vmem:[#allocation4 + $0xaa0] sm:$0xff] }
 0x12b   : > { %3344 = vmatprep.subr.mxu1 %v727_v1  ;;  %3310 = vmatpush3.msra.mxu0 %v679_v2  ;;  %v777_v63 = vld [vmem:[#allocation4 + $0xb28] sm:$0xff]  ;;  %v792_v1 = vld [vmem:[#allocation4 + $0xba0] sm:$0xff] }
 0x12c   : > { %3345 = vmatpush3.msra.mxu1 %v711_v3  ;;  %3311 = vmatprep.subr.mxu0 %v694_v4  ;;  %v744_v2 = vld [vmem:[#allocation4 + $0xa20] sm:$0xff]  ;;  %v759_v4 = vld [vmem:[#allocation4 + $0xa98] sm:$0xff] }
 0x12d   : > { %3346 = vmatprep.subr.mxu1 %v726_v5  ;;  %3312 = vmatpush3.msra.mxu0 %v678_v6  ;;  %v776_v3 = vld [vmem:[#allocation4 + $0xb20] sm:$0xff]  ;;  %v791_v5 = vld [vmem:[#allocation4 + $0xb98] sm:$0xff] }
 0x12e   : > { %3347 = vmatpush3.msra.mxu1 %v710_v7  ;;  %3313 = vmatprep.subr.mxu0 %v693_v8  ;;  %v743_v6 = vld [vmem:[#allocation4 + $0xa18] sm:$0xff]  ;;  %v758_v8 = vld [vmem:[#allocation4 + $0xa90] sm:$0xff] }
 0x12f   : > { %3348 = vmatprep.subr.mxu1 %v725_v9  ;;  %3314 = vmatpush3.msra.mxu0 %v677_v10  ;;  %v775_v7 = vld [vmem:[#allocation4 + $0xb18] sm:$0xff]  ;;  %v790_v9 = vld [vmem:[#allocation4 + $0xb90] sm:$0xff] }
 0x130   : > { %3349 = vmatpush3.msra.mxu1 %v709_v11  ;;  %3315 = vmatprep.subr.mxu0 %v692_v12  ;;  %v742_v10 = vld [vmem:[#allocation4 + $0xa10] sm:$0xff]  ;;  %v757_v12 = vld [vmem:[#allocation4 + $0xa88] sm:$0xff] }
 0x131   : > { %3350 = vmatprep.subr.mxu1 %v724_v13  ;;  %3316 = vmatpush3.msra.mxu0 %v676_v14  ;;  %v774_v11 = vld [vmem:[#allocation4 + $0xb10] sm:$0xff]  ;;  %v789_v13 = vld [vmem:[#allocation4 + $0xb88] sm:$0xff] }
 0x132   : > { %1753 = vmatprep.mubr.f32.mxu0 %v393_v15  ;;  %3351 = vmatpush3.msra.mxu1 %v708_v16  ;;  %v741_v14 = vld [vmem:[#allocation4 + $0xa08] sm:$0xff]  ;;  %v756_v16 = vld [vmem:[#allocation4 + $0xa80] sm:$0xff] }
 0x133   : > { %1823 = vmatprep.mubr.f32.mxu1 %v395_v17  ;;  %1754 = vmatmul.mubr.f32.vlgmr.msra.gmra.mxu0 %v392_v18  ;;  %v773_v15 = vld [vmem:[#allocation4 + $0xb08] sm:$0xff]  ;;  %v788_v17 = vld [vmem:[#allocation4 + $0xb80] sm:$0xff] }
 0x134   : > { %1824 = vmatmul.mubr.f32.vlgmr.msra.gmra.mxu1 %v394_v19  ;;  %3355 = vmatprep.subr.mxu0 %v771_v20  ;;  %v740_v18 = vld [vmem:[#allocation4 + $0xa00] sm:$0xff]  ;;  %v397_v19 = vld [vmem:[%s4383_s27 + $0xa8] sm:$0xff] }
 0x135   : > { %3390 = vmatprep.subr.mxu1 %v803_v21  ;;  %3356 = vmatpush3.msra.mxu0 %v755_v22  ;;  %v772_v20 = vld [vmem:[#allocation4 + $0xb00] sm:$0xff]  ;;  %v399_v21 = vld [vmem:[%s4383_s27 + $0xb8] sm:$0xff] }
 0x136   : > { %3391 = vmatpush3.msra.mxu1 %v787_v23  ;;  %3357 = vmatprep.subr.mxu0 %v770_v24  ;;  %v396_v22 = vld [vmem:[%s4383_s27 + $0xa0] sm:$0xff]  ;;  %v398_v23 = vld [vmem:[%s4383_s27 + $0xb0] sm:$0xff]  ;;  %v835_v24 = vld [vmem:[#allocation4 + $0xcf8] sm:$0xff] }
 0x137   : > { %3392 = vmatprep.subr.mxu1 %v802_v25  ;;  %3358 = vmatpush3.msra.mxu0 %v754_v26  ;;  %v867_v25 = vld [vmem:[#allocation4 + $0xdf8] sm:$0xff] }
 0x138   : > { %3393 = vmatpush3.msra.mxu1 %v786_v27  ;;  %3359 = vmatprep.subr.mxu0 %v769_v28  ;;  %v819_v26 = vld [vmem:[#allocation4 + $0xc78] sm:$0xff]  ;;  %v834_v28 = vld [vmem:[#allocation4 + $0xcf0] sm:$0xff] }
 0x139   : > { %3394 = vmatprep.subr.mxu1 %v801_v29  ;;  %3360 = vmatpush3.msra.mxu0 %v753_v30  ;;  %v851_v27 = vld [vmem:[#allocation4 + $0xd78] sm:$0xff]  ;;  %v866_v29 = vld [vmem:[#allocation4 + $0xdf0] sm:$0xff] }
 0x13a   : > { %3395 = vmatpush3.msra.mxu1 %v785_v31  ;;  %3361 = vmatprep.subr.mxu0 %v768_v32  ;;  %v818_v30 = vld [vmem:[#allocation4 + $0xc70] sm:$0xff]  ;;  %v833_v32 = vld [vmem:[#allocation4 + $0xce8] sm:$0xff] }
 0x13b   : > { %3396 = vmatprep.subr.mxu1 %v800_v33  ;;  %3362 = vmatpush3.msra.mxu0 %v752_v34  ;;  %v850_v31 = vld [vmem:[#allocation4 + $0xd70] sm:$0xff]  ;;  %v865_v33 = vld [vmem:[#allocation4 + $0xde8] sm:$0xff] }
 0x13c   : > { %3397 = vmatpush3.msra.mxu1 %v784_v35  ;;  %3363 = vmatprep.subr.mxu0 %v767_v36  ;;  %v817_v34 = vld [vmem:[#allocation4 + $0xc68] sm:$0xff]  ;;  %v832_v36 = vld [vmem:[#allocation4 + $0xce0] sm:$0xff] }
 0x13d   : > { %3398 = vmatprep.subr.mxu1 %v799_v37  ;;  %3364 = vmatpush3.msra.mxu0 %v751_v38  ;;  %v849_v35 = vld [vmem:[#allocation4 + $0xd68] sm:$0xff]  ;;  %v864_v37 = vld [vmem:[#allocation4 + $0xde0] sm:$0xff] }
 0x13e   : > { %3399 = vmatpush3.msra.mxu1 %v783_v39  ;;  %3365 = vmatprep.subr.mxu0 %v766_v40  ;;  %v816_v38 = vld [vmem:[#allocation4 + $0xc60] sm:$0xff]  ;;  %v831_v40 = vld [vmem:[#allocation4 + $0xcd8] sm:$0xff] }
 0x13f   : > { %3400 = vmatprep.subr.mxu1 %v798_v41  ;;  %3366 = vmatpush3.msra.mxu0 %v750_v42  ;;  %v848_v39 = vld [vmem:[#allocation4 + $0xd60] sm:$0xff]  ;;  %v863_v41 = vld [vmem:[#allocation4 + $0xdd8] sm:$0xff] }
 0x140   : > { %3401 = vmatpush3.msra.mxu1 %v782_v43  ;;  %3367 = vmatprep.subr.mxu0 %v765_v44  ;;  %v815_v42 = vld [vmem:[#allocation4 + $0xc58] sm:$0xff]  ;;  %v830_v44 = vld [vmem:[#allocation4 + $0xcd0] sm:$0xff] }
 0x141   : > { %3402 = vmatprep.subr.mxu1 %v797_v45  ;;  %3368 = vmatpush3.msra.mxu0 %v749_v46  ;;  %v847_v43 = vld [vmem:[#allocation4 + $0xd58] sm:$0xff]  ;;  %v862_v45 = vld [vmem:[#allocation4 + $0xdd0] sm:$0xff] }
 0x142   : > { %3403 = vmatpush3.msra.mxu1 %v781_v47  ;;  %3369 = vmatprep.subr.mxu0 %v764_v48  ;;  %v814_v46 = vld [vmem:[#allocation4 + $0xc50] sm:$0xff]  ;;  %v829_v48 = vld [vmem:[#allocation4 + $0xcc8] sm:$0xff] }
 0x143   : > { %3404 = vmatprep.subr.mxu1 %v796_v49  ;;  %3370 = vmatpush3.msra.mxu0 %v748_v50  ;;  %v846_v47 = vld [vmem:[#allocation4 + $0xd50] sm:$0xff]  ;;  %v861_v49 = vld [vmem:[#allocation4 + $0xdc8] sm:$0xff] }
 0x144   : > { %3405 = vmatpush3.msra.mxu1 %v780_v51  ;;  %3371 = vmatprep.subr.mxu0 %v763_v52  ;;  %v813_v50 = vld [vmem:[#allocation4 + $0xc48] sm:$0xff]  ;;  %v828_v52 = vld [vmem:[#allocation4 + $0xcc0] sm:$0xff] }
 0x145   : > { %3406 = vmatprep.subr.mxu1 %v795_v53  ;;  %3372 = vmatpush3.msra.mxu0 %v747_v54  ;;  %v845_v51 = vld [vmem:[#allocation4 + $0xd48] sm:$0xff]  ;;  %v860_v53 = vld [vmem:[#allocation4 + $0xdc0] sm:$0xff] }
 0x146   : > { %3407 = vmatpush3.msra.mxu1 %v779_v55  ;;  %3373 = vmatprep.subr.mxu0 %v762_v56  ;;  %v812_v54 = vld [vmem:[#allocation4 + $0xc40] sm:$0xff]  ;;  %v827_v56 = vld [vmem:[#allocation4 + $0xcb8] sm:$0xff] }
 0x147   : > { %3408 = vmatprep.subr.mxu1 %v794_v57  ;;  %3374 = vmatpush3.msra.mxu0 %v746_v58  ;;  %v844_v55 = vld [vmem:[#allocation4 + $0xd40] sm:$0xff]  ;;  %v859_v57 = vld [vmem:[#allocation4 + $0xdb8] sm:$0xff] }
 0x148   : > { %3409 = vmatpush3.msra.mxu1 %v778_v59  ;;  %3375 = vmatprep.subr.mxu0 %v761_v60  ;;  %v811_v58 = vld [vmem:[#allocation4 + $0xc38] sm:$0xff]  ;;  %v826_v60 = vld [vmem:[#allocation4 + $0xcb0] sm:$0xff] }
 0x149   : > { %3410 = vmatprep.subr.mxu1 %v793_v61  ;;  %3376 = vmatpush3.msra.mxu0 %v745_v62  ;;  %v843_v59 = vld [vmem:[#allocation4 + $0xd38] sm:$0xff]  ;;  %v858_v61 = vld [vmem:[#allocation4 + $0xdb0] sm:$0xff] }
 0x14a   : > { %3411 = vmatpush3.msra.mxu1 %v777_v63  ;;  %3377 = vmatprep.subr.mxu0 %v760_v0  ;;  %v810_v62 = vld [vmem:[#allocation4 + $0xc30] sm:$0xff]  ;;  %v825_v0 = vld [vmem:[#allocation4 + $0xca8] sm:$0xff] }
 0x14b   : > { %3412 = vmatprep.subr.mxu1 %v792_v1  ;;  %3378 = vmatpush3.msra.mxu0 %v744_v2  ;;  %v842_v63 = vld [vmem:[#allocation4 + $0xd30] sm:$0xff]  ;;  %v857_v1 = vld [vmem:[#allocation4 + $0xda8] sm:$0xff] }
 0x14c   : > { %3413 = vmatpush3.msra.mxu1 %v776_v3  ;;  %3379 = vmatprep.subr.mxu0 %v759_v4  ;;  %v809_v2 = vld [vmem:[#allocation4 + $0xc28] sm:$0xff]  ;;  %v824_v4 = vld [vmem:[#allocation4 + $0xca0] sm:$0xff] }
 0x14d   : > { %3414 = vmatprep.subr.mxu1 %v791_v5  ;;  %3380 = vmatpush3.msra.mxu0 %v743_v6  ;;  %v841_v3 = vld [vmem:[#allocation4 + $0xd28] sm:$0xff]  ;;  %v856_v5 = vld [vmem:[#allocation4 + $0xda0] sm:$0xff] }
 0x14e   : > { %3415 = vmatpush3.msra.mxu1 %v775_v7  ;;  %3381 = vmatprep.subr.mxu0 %v758_v8  ;;  %v808_v6 = vld [vmem:[#allocation4 + $0xc20] sm:$0xff]  ;;  %v823_v8 = vld [vmem:[#allocation4 + $0xc98] sm:$0xff] }
 0x14f   : > { %3416 = vmatprep.subr.mxu1 %v790_v9  ;;  %3382 = vmatpush3.msra.mxu0 %v742_v10  ;;  %v840_v7 = vld [vmem:[#allocation4 + $0xd20] sm:$0xff]  ;;  %v855_v9 = vld [vmem:[#allocation4 + $0xd98] sm:$0xff] }
 0x150   : > { %3417 = vmatpush3.msra.mxu1 %v774_v11  ;;  %3383 = vmatprep.subr.mxu0 %v757_v12  ;;  %v807_v10 = vld [vmem:[#allocation4 + $0xc18] sm:$0xff]  ;;  %v822_v12 = vld [vmem:[#allocation4 + $0xc90] sm:$0xff] }
 0x151   : > { %3418 = vmatprep.subr.mxu1 %v789_v13  ;;  %3384 = vmatpush3.msra.mxu0 %v741_v14  ;;  %v839_v11 = vld [vmem:[#allocation4 + $0xd18] sm:$0xff]  ;;  %v854_v13 = vld [vmem:[#allocation4 + $0xd90] sm:$0xff] }
 0x152   : > { %3419 = vmatpush3.msra.mxu1 %v773_v15  ;;  %3385 = vmatprep.subr.mxu0 %v756_v16  ;;  %v806_v14 = vld [vmem:[#allocation4 + $0xc10] sm:$0xff]  ;;  %v821_v16 = vld [vmem:[#allocation4 + $0xc88] sm:$0xff] }
 0x153   : > { %3420 = vmatprep.subr.mxu1 %v788_v17  ;;  %3386 = vmatpush3.msra.mxu0 %v740_v18  ;;  %v838_v15 = vld [vmem:[#allocation4 + $0xd10] sm:$0xff]  ;;  %v853_v17 = vld [vmem:[#allocation4 + $0xd88] sm:$0xff] }
 0x154   : > { %1893 = vmatprep.mubr.f32.mxu0 %v397_v19  ;;  %3421 = vmatpush3.msra.mxu1 %v772_v20  ;;  %v805_v18 = vld [vmem:[#allocation4 + $0xc08] sm:$0xff]  ;;  %v820_v20 = vld [vmem:[#allocation4 + $0xc80] sm:$0xff] }
 0x155   : > { %1963 = vmatprep.mubr.f32.mxu1 %v399_v21  ;;  %1894 = vmatmul.mubr.f32.vlgmr.msra.gmra.mxu0 %v396_v22  ;;  %v837_v19 = vld [vmem:[#allocation4 + $0xd08] sm:$0xff]  ;;  %v852_v21 = vld [vmem:[#allocation4 + $0xd80] sm:$0xff] }
 0x156   : > { %1964 = vmatmul.mubr.f32.vlgmr.msra.gmra.mxu1 %v398_v23  ;;  %3425 = vmatprep.subr.mxu0 %v835_v24  ;;  %v804_v22 = vld [vmem:[#allocation4 + $0xc00] sm:$0xff]  ;;  %v401_v23 = vld [vmem:[%s4383_s27 + $0xc8] sm:$0xff] }
 0x157   : > { %3460 = vmatprep.subr.mxu1 %v867_v25  ;;  %3426 = vmatpush3.msra.mxu0 %v819_v26  ;;  %v836_v24 = vld [vmem:[#allocation4 + $0xd00] sm:$0xff]  ;;  %v403_v25 = vld [vmem:[%s4383_s27 + $0xd8] sm:$0xff] }
 0x158   : > { %3461 = vmatpush3.msra.mxu1 %v851_v27  ;;  %3427 = vmatprep.subr.mxu0 %v834_v28  ;;  %v400_v26 = vld [vmem:[%s4383_s27 + $0xc0] sm:$0xff]  ;;  %v402_v27 = vld [vmem:[%s4383_s27 + $0xd0] sm:$0xff]  ;;  %v899_v28 = vld [vmem:[#allocation4 + $0xef8] sm:$0xff] }
 0x159   : > { %3462 = vmatprep.subr.mxu1 %v866_v29  ;;  %3428 = vmatpush3.msra.mxu0 %v818_v30  ;;  %v931_v29 = vld [vmem:[#allocation4 + $0xff8] sm:$0xff] }
 0x15a   : > { %3463 = vmatpush3.msra.mxu1 %v850_v31  ;;  %3429 = vmatprep.subr.mxu0 %v833_v32  ;;  %v883_v30 = vld [vmem:[#allocation4 + $0xe78] sm:$0xff]  ;;  %v898_v32 = vld [vmem:[#allocation4 + $0xef0] sm:$0xff] }
 0x15b   : > { %3464 = vmatprep.subr.mxu1 %v865_v33  ;;  %3430 = vmatpush3.msra.mxu0 %v817_v34  ;;  %v915_v31 = vld [vmem:[#allocation4 + $0xf78] sm:$0xff]  ;;  %v930_v33 = vld [vmem:[#allocation4 + $0xff0] sm:$0xff] }
 0x15c   : > { %3465 = vmatpush3.msra.mxu1 %v849_v35  ;;  %3431 = vmatprep.subr.mxu0 %v832_v36  ;;  %v882_v34 = vld [vmem:[#allocation4 + $0xe70] sm:$0xff]  ;;  %v897_v36 = vld [vmem:[#allocation4 + $0xee8] sm:$0xff] }
 0x15d   : > { %3466 = vmatprep.subr.mxu1 %v864_v37  ;;  %3432 = vmatpush3.msra.mxu0 %v816_v38  ;;  %v914_v35 = vld [vmem:[#allocation4 + $0xf70] sm:$0xff]  ;;  %v929_v37 = vld [vmem:[#allocation4 + $0xfe8] sm:$0xff] }
 0x15e   : > { %3467 = vmatpush3.msra.mxu1 %v848_v39  ;;  %3433 = vmatprep.subr.mxu0 %v831_v40  ;;  %v881_v38 = vld [vmem:[#allocation4 + $0xe68] sm:$0xff]  ;;  %v896_v40 = vld [vmem:[#allocation4 + $0xee0] sm:$0xff] }
 0x15f   : > { %3468 = vmatprep.subr.mxu1 %v863_v41  ;;  %3434 = vmatpush3.msra.mxu0 %v815_v42  ;;  %v913_v39 = vld [vmem:[#allocation4 + $0xf68] sm:$0xff]  ;;  %v928_v41 = vld [vmem:[#allocation4 + $0xfe0] sm:$0xff] }
 0x160   : > { %3469 = vmatpush3.msra.mxu1 %v847_v43  ;;  %3435 = vmatprep.subr.mxu0 %v830_v44  ;;  %v880_v42 = vld [vmem:[#allocation4 + $0xe60] sm:$0xff]  ;;  %v895_v44 = vld [vmem:[#allocation4 + $0xed8] sm:$0xff] }
 0x161   : > { %3470 = vmatprep.subr.mxu1 %v862_v45  ;;  %3436 = vmatpush3.msra.mxu0 %v814_v46  ;;  %v912_v43 = vld [vmem:[#allocation4 + $0xf60] sm:$0xff]  ;;  %v927_v45 = vld [vmem:[#allocation4 + $0xfd8] sm:$0xff] }
 0x162   : > { %3471 = vmatpush3.msra.mxu1 %v846_v47  ;;  %3437 = vmatprep.subr.mxu0 %v829_v48  ;;  %v879_v46 = vld [vmem:[#allocation4 + $0xe58] sm:$0xff]  ;;  %v894_v48 = vld [vmem:[#allocation4 + $0xed0] sm:$0xff] }
 0x163   : > { %3472 = vmatprep.subr.mxu1 %v861_v49  ;;  %3438 = vmatpush3.msra.mxu0 %v813_v50  ;;  %v911_v47 = vld [vmem:[#allocation4 + $0xf58] sm:$0xff]  ;;  %v926_v49 = vld [vmem:[#allocation4 + $0xfd0] sm:$0xff] }
 0x164   : > { %3473 = vmatpush3.msra.mxu1 %v845_v51  ;;  %3439 = vmatprep.subr.mxu0 %v828_v52  ;;  %v878_v50 = vld [vmem:[#allocation4 + $0xe50] sm:$0xff]  ;;  %v893_v52 = vld [vmem:[#allocation4 + $0xec8] sm:$0xff] }
 0x165   : > { %3474 = vmatprep.subr.mxu1 %v860_v53  ;;  %3440 = vmatpush3.msra.mxu0 %v812_v54  ;;  %v910_v51 = vld [vmem:[#allocation4 + $0xf50] sm:$0xff]  ;;  %v925_v53 = vld [vmem:[#allocation4 + $0xfc8] sm:$0xff] }
 0x166   : > { %3475 = vmatpush3.msra.mxu1 %v844_v55  ;;  %3441 = vmatprep.subr.mxu0 %v827_v56  ;;  %v877_v54 = vld [vmem:[#allocation4 + $0xe48] sm:$0xff]  ;;  %v892_v56 = vld [vmem:[#allocation4 + $0xec0] sm:$0xff] }
 0x167   : > { %3476 = vmatprep.subr.mxu1 %v859_v57  ;;  %3442 = vmatpush3.msra.mxu0 %v811_v58  ;;  %v909_v55 = vld [vmem:[#allocation4 + $0xf48] sm:$0xff]  ;;  %v924_v57 = vld [vmem:[#allocation4 + $0xfc0] sm:$0xff] }
 0x168   : > { %3477 = vmatpush3.msra.mxu1 %v843_v59  ;;  %3443 = vmatprep.subr.mxu0 %v826_v60  ;;  %v876_v58 = vld [vmem:[#allocation4 + $0xe40] sm:$0xff]  ;;  %v891_v60 = vld [vmem:[#allocation4 + $0xeb8] sm:$0xff] }
 0x169   : > { %3478 = vmatprep.subr.mxu1 %v858_v61  ;;  %3444 = vmatpush3.msra.mxu0 %v810_v62  ;;  %v908_v59 = vld [vmem:[#allocation4 + $0xf40] sm:$0xff]  ;;  %v923_v61 = vld [vmem:[#allocation4 + $0xfb8] sm:$0xff] }
 0x16a   : > { %3479 = vmatpush3.msra.mxu1 %v842_v63  ;;  %3445 = vmatprep.subr.mxu0 %v825_v0  ;;  %v875_v62 = vld [vmem:[#allocation4 + $0xe38] sm:$0xff]  ;;  %v890_v0 = vld [vmem:[#allocation4 + $0xeb0] sm:$0xff] }
 0x16b   : > { %3480 = vmatprep.subr.mxu1 %v857_v1  ;;  %3446 = vmatpush3.msra.mxu0 %v809_v2  ;;  %v907_v63 = vld [vmem:[#allocation4 + $0xf38] sm:$0xff]  ;;  %v922_v1 = vld [vmem:[#allocation4 + $0xfb0] sm:$0xff] }
 0x16c   : > { %3481 = vmatpush3.msra.mxu1 %v841_v3  ;;  %3447 = vmatprep.subr.mxu0 %v824_v4  ;;  %v874_v2 = vld [vmem:[#allocation4 + $0xe30] sm:$0xff]  ;;  %v889_v4 = vld [vmem:[#allocation4 + $0xea8] sm:$0xff] }
 0x16d   : > { %3482 = vmatprep.subr.mxu1 %v856_v5  ;;  %3448 = vmatpush3.msra.mxu0 %v808_v6  ;;  %v906_v3 = vld [vmem:[#allocation4 + $0xf30] sm:$0xff]  ;;  %v921_v5 = vld [vmem:[#allocation4 + $0xfa8] sm:$0xff] }
 0x16e   : > { %3483 = vmatpush3.msra.mxu1 %v840_v7  ;;  %3449 = vmatprep.subr.mxu0 %v823_v8  ;;  %v873_v6 = vld [vmem:[#allocation4 + $0xe28] sm:$0xff]  ;;  %v888_v8 = vld [vmem:[#allocation4 + $0xea0] sm:$0xff] }
 0x16f   : > { %3484 = vmatprep.subr.mxu1 %v855_v9  ;;  %3450 = vmatpush3.msra.mxu0 %v807_v10  ;;  %v905_v7 = vld [vmem:[#allocation4 + $0xf28] sm:$0xff]  ;;  %v920_v9 = vld [vmem:[#allocation4 + $0xfa0] sm:$0xff] }
 0x170   : > { %3485 = vmatpush3.msra.mxu1 %v839_v11  ;;  %3451 = vmatprep.subr.mxu0 %v822_v12  ;;  %v872_v10 = vld [vmem:[#allocation4 + $0xe20] sm:$0xff]  ;;  %v887_v12 = vld [vmem:[#allocation4 + $0xe98] sm:$0xff] }
 0x171   : > { %3486 = vmatprep.subr.mxu1 %v854_v13  ;;  %3452 = vmatpush3.msra.mxu0 %v806_v14  ;;  %v904_v11 = vld [vmem:[#allocation4 + $0xf20] sm:$0xff]  ;;  %v919_v13 = vld [vmem:[#allocation4 + $0xf98] sm:$0xff] }
 0x172   : > { %3487 = vmatpush3.msra.mxu1 %v838_v15  ;;  %3453 = vmatprep.subr.mxu0 %v821_v16  ;;  %v871_v14 = vld [vmem:[#allocation4 + $0xe18] sm:$0xff]  ;;  %v886_v16 = vld [vmem:[#allocation4 + $0xe90] sm:$0xff] }
 0x173   : > { %3488 = vmatprep.subr.mxu1 %v853_v17  ;;  %3454 = vmatpush3.msra.mxu0 %v805_v18  ;;  %v903_v15 = vld [vmem:[#allocation4 + $0xf18] sm:$0xff]  ;;  %v918_v17 = vld [vmem:[#allocation4 + $0xf90] sm:$0xff] }
 0x174   : > { %3489 = vmatpush3.msra.mxu1 %v837_v19  ;;  %3455 = vmatprep.subr.mxu0 %v820_v20  ;;  %v870_v18 = vld [vmem:[#allocation4 + $0xe10] sm:$0xff]  ;;  %v885_v20 = vld [vmem:[#allocation4 + $0xe88] sm:$0xff] }
 0x175   : > { %3490 = vmatprep.subr.mxu1 %v852_v21  ;;  %3456 = vmatpush3.msra.mxu0 %v804_v22  ;;  %v902_v19 = vld [vmem:[#allocation4 + $0xf10] sm:$0xff]  ;;  %v917_v21 = vld [vmem:[#allocation4 + $0xf88] sm:$0xff] }
 0x176   : > { %2033 = vmatprep.mubr.f32.mxu0 %v401_v23  ;;  %3491 = vmatpush3.msra.mxu1 %v836_v24  ;;  %v869_v22 = vld [vmem:[#allocation4 + $0xe08] sm:$0xff]  ;;  %v884_v24 = vld [vmem:[#allocation4 + $0xe80] sm:$0xff] }
 0x177   : > { %2103 = vmatprep.mubr.f32.mxu1 %v403_v25  ;;  %2034 = vmatmul.mubr.f32.vlgmr.msra.gmra.mxu0 %v400_v26  ;;  %v901_v23 = vld [vmem:[#allocation4 + $0xf08] sm:$0xff]  ;;  %v916_v25 = vld [vmem:[#allocation4 + $0xf80] sm:$0xff] }
 0x178   : > { %2104 = vmatmul.mubr.f32.vlgmr.msra.gmra.mxu1 %v402_v27  ;;  %3495 = vmatprep.subr.mxu0 %v899_v28  ;;  %v868_v26 = vld [vmem:[#allocation4 + $0xe00] sm:$0xff]  ;;  %v405_v27 = vld [vmem:[%s4383_s27 + $0xe8] sm:$0xff] }
 0x179   : > { %3530 = vmatprep.subr.mxu1 %v931_v29  ;;  %3496 = vmatpush3.msra.mxu0 %v883_v30  ;;  %v900_v28 = vld [vmem:[#allocation4 + $0xf00] sm:$0xff]  ;;  %v407_v29 = vld [vmem:[%s4383_s27 + $0xf8] sm:$0xff] }
 0x17a   : > { %3531 = vmatpush3.msra.mxu1 %v915_v31  ;;  %3497 = vmatprep.subr.mxu0 %v898_v32  ;;  %v404_v30 = vld [vmem:[%s4383_s27 + $0xe0] sm:$0xff]  ;;  %v406_v31 = vld [vmem:[%s4383_s27 + $0xf0] sm:$0xff]  ;;  %v963_v32 = vld [vmem:[#allocation4 + $0x10f8] sm:$0xff] }
 0x17b   : > { %3532 = vmatprep.subr.mxu1 %v930_v33  ;;  %3498 = vmatpush3.msra.mxu0 %v882_v34  ;;  %v995_v33 = vld [vmem:[#allocation4 + $0x11f8] sm:$0xff] }
 0x17c   : > { %3533 = vmatpush3.msra.mxu1 %v914_v35  ;;  %3499 = vmatprep.subr.mxu0 %v897_v36  ;;  %v947_v34 = vld [vmem:[#allocation4 + $0x1078] sm:$0xff]  ;;  %v962_v36 = vld [vmem:[#allocation4 + $0x10f0] sm:$0xff] }
 0x17d   : > { %3534 = vmatprep.subr.mxu1 %v929_v37  ;;  %3500 = vmatpush3.msra.mxu0 %v881_v38  ;;  %v979_v35 = vld [vmem:[#allocation4 + $0x1178] sm:$0xff]  ;;  %v994_v37 = vld [vmem:[#allocation4 + $0x11f0] sm:$0xff] }
 0x17e   : > { %3535 = vmatpush3.msra.mxu1 %v913_v39  ;;  %3501 = vmatprep.subr.mxu0 %v896_v40  ;;  %v946_v38 = vld [vmem:[#allocation4 + $0x1070] sm:$0xff]  ;;  %v961_v40 = vld [vmem:[#allocation4 + $0x10e8] sm:$0xff] }
 0x17f   : > { %3536 = vmatprep.subr.mxu1 %v928_v41  ;;  %3502 = vmatpush3.msra.mxu0 %v880_v42  ;;  %v978_v39 = vld [vmem:[#allocation4 + $0x1170] sm:$0xff]  ;;  %v993_v41 = vld [vmem:[#allocation4 + $0x11e8] sm:$0xff] }
 0x180   : > { %3537 = vmatpush3.msra.mxu1 %v912_v43  ;;  %3503 = vmatprep.subr.mxu0 %v895_v44  ;;  %v945_v42 = vld [vmem:[#allocation4 + $0x1068] sm:$0xff]  ;;  %v960_v44 = vld [vmem:[#allocation4 + $0x10e0] sm:$0xff] }
 0x181   : > { %3538 = vmatprep.subr.mxu1 %v927_v45  ;;  %3504 = vmatpush3.msra.mxu0 %v879_v46  ;;  %v977_v43 = vld [vmem:[#allocation4 + $0x1168] sm:$0xff]  ;;  %v992_v45 = vld [vmem:[#allocation4 + $0x11e0] sm:$0xff] }
 0x182   : > { %3539 = vmatpush3.msra.mxu1 %v911_v47  ;;  %3505 = vmatprep.subr.mxu0 %v894_v48  ;;  %v944_v46 = vld [vmem:[#allocation4 + $0x1060] sm:$0xff]  ;;  %v959_v48 = vld [vmem:[#allocation4 + $0x10d8] sm:$0xff] }
 0x183   : > { %3540 = vmatprep.subr.mxu1 %v926_v49  ;;  %3506 = vmatpush3.msra.mxu0 %v878_v50  ;;  %v976_v47 = vld [vmem:[#allocation4 + $0x1160] sm:$0xff]  ;;  %v991_v49 = vld [vmem:[#allocation4 + $0x11d8] sm:$0xff] }
 0x184   : > { %3541 = vmatpush3.msra.mxu1 %v910_v51  ;;  %3507 = vmatprep.subr.mxu0 %v893_v52  ;;  %v943_v50 = vld [vmem:[#allocation4 + $0x1058] sm:$0xff]  ;;  %v958_v52 = vld [vmem:[#allocation4 + $0x10d0] sm:$0xff] }
 0x185   : > { %3542 = vmatprep.subr.mxu1 %v925_v53  ;;  %3508 = vmatpush3.msra.mxu0 %v877_v54  ;;  %v975_v51 = vld [vmem:[#allocation4 + $0x1158] sm:$0xff]  ;;  %v990_v53 = vld [vmem:[#allocation4 + $0x11d0] sm:$0xff] }
 0x186   : > { %3543 = vmatpush3.msra.mxu1 %v909_v55  ;;  %3509 = vmatprep.subr.mxu0 %v892_v56  ;;  %v942_v54 = vld [vmem:[#allocation4 + $0x1050] sm:$0xff]  ;;  %v957_v56 = vld [vmem:[#allocation4 + $0x10c8] sm:$0xff] }
 0x187   : > { %3544 = vmatprep.subr.mxu1 %v924_v57  ;;  %3510 = vmatpush3.msra.mxu0 %v876_v58  ;;  %v974_v55 = vld [vmem:[#allocation4 + $0x1150] sm:$0xff]  ;;  %v989_v57 = vld [vmem:[#allocation4 + $0x11c8] sm:$0xff] }
 0x188   : > { %3545 = vmatpush3.msra.mxu1 %v908_v59  ;;  %3511 = vmatprep.subr.mxu0 %v891_v60  ;;  %v941_v58 = vld [vmem:[#allocation4 + $0x1048] sm:$0xff]  ;;  %v956_v60 = vld [vmem:[#allocation4 + $0x10c0] sm:$0xff] }
 0x189   : > { %3546 = vmatprep.subr.mxu1 %v923_v61  ;;  %3512 = vmatpush3.msra.mxu0 %v875_v62  ;;  %v973_v59 = vld [vmem:[#allocation4 + $0x1148] sm:$0xff]  ;;  %v988_v61 = vld [vmem:[#allocation4 + $0x11c0] sm:$0xff] }
 0x18a   : > { %3547 = vmatpush3.msra.mxu1 %v907_v63  ;;  %3513 = vmatprep.subr.mxu0 %v890_v0  ;;  %v940_v62 = vld [vmem:[#allocation4 + $0x1040] sm:$0xff]  ;;  %v955_v0 = vld [vmem:[#allocation4 + $0x10b8] sm:$0xff] }
 0x18b   : > { %3548 = vmatprep.subr.mxu1 %v922_v1  ;;  %3514 = vmatpush3.msra.mxu0 %v874_v2  ;;  %v972_v63 = vld [vmem:[#allocation4 + $0x1140] sm:$0xff]  ;;  %v987_v1 = vld [vmem:[#allocation4 + $0x11b8] sm:$0xff] }
 0x18c   : > { %3549 = vmatpush3.msra.mxu1 %v906_v3  ;;  %3515 = vmatprep.subr.mxu0 %v889_v4  ;;  %v939_v2 = vld [vmem:[#allocation4 + $0x1038] sm:$0xff]  ;;  %v954_v4 = vld [vmem:[#allocation4 + $0x10b0] sm:$0xff] }
 0x18d   : > { %3550 = vmatprep.subr.mxu1 %v921_v5  ;;  %3516 = vmatpush3.msra.mxu0 %v873_v6  ;;  %v971_v3 = vld [vmem:[#allocation4 + $0x1138] sm:$0xff]  ;;  %v986_v5 = vld [vmem:[#allocation4 + $0x11b0] sm:$0xff] }
 0x18e   : > { %3551 = vmatpush3.msra.mxu1 %v905_v7  ;;  %3517 = vmatprep.subr.mxu0 %v888_v8  ;;  %v938_v6 = vld [vmem:[#allocation4 + $0x1030] sm:$0xff]  ;;  %v953_v8 = vld [vmem:[#allocation4 + $0x10a8] sm:$0xff] }
 0x18f   : > { %3552 = vmatprep.subr.mxu1 %v920_v9  ;;  %3518 = vmatpush3.msra.mxu0 %v872_v10  ;;  %v970_v7 = vld [vmem:[#allocation4 + $0x1130] sm:$0xff]  ;;  %v985_v9 = vld [vmem:[#allocation4 + $0x11a8] sm:$0xff] }
 0x190   : > { %3553 = vmatpush3.msra.mxu1 %v904_v11  ;;  %3519 = vmatprep.subr.mxu0 %v887_v12  ;;  %v937_v10 = vld [vmem:[#allocation4 + $0x1028] sm:$0xff]  ;;  %v952_v12 = vld [vmem:[#allocation4 + $0x10a0] sm:$0xff] }
 0x191   : > { %3554 = vmatprep.subr.mxu1 %v919_v13  ;;  %3520 = vmatpush3.msra.mxu0 %v871_v14  ;;  %v969_v11 = vld [vmem:[#allocation4 + $0x1128] sm:$0xff]  ;;  %v984_v13 = vld [vmem:[#allocation4 + $0x11a0] sm:$0xff] }
 0x192   : > { %3555 = vmatpush3.msra.mxu1 %v903_v15  ;;  %3521 = vmatprep.subr.mxu0 %v886_v16  ;;  %v936_v14 = vld [vmem:[#allocation4 + $0x1020] sm:$0xff]  ;;  %v951_v16 = vld [vmem:[#allocation4 + $0x1098] sm:$0xff] }
 0x193   : > { %3556 = vmatprep.subr.mxu1 %v918_v17  ;;  %3522 = vmatpush3.msra.mxu0 %v870_v18  ;;  %v968_v15 = vld [vmem:[#allocation4 + $0x1120] sm:$0xff]  ;;  %v983_v17 = vld [vmem:[#allocation4 + $0x1198] sm:$0xff] }
 0x194   : > { %3557 = vmatpush3.msra.mxu1 %v902_v19  ;;  %3523 = vmatprep.subr.mxu0 %v885_v20  ;;  %v935_v18 = vld [vmem:[#allocation4 + $0x1018] sm:$0xff]  ;;  %v950_v20 = vld [vmem:[#allocation4 + $0x1090] sm:$0xff] }
 0x195   : > { %3558 = vmatprep.subr.mxu1 %v917_v21  ;;  %3524 = vmatpush3.msra.mxu0 %v869_v22  ;;  %v967_v19 = vld [vmem:[#allocation4 + $0x1118] sm:$0xff]  ;;  %v982_v21 = vld [vmem:[#allocation4 + $0x1190] sm:$0xff] }
 0x196   : > { %3559 = vmatpush3.msra.mxu1 %v901_v23  ;;  %3525 = vmatprep.subr.mxu0 %v884_v24  ;;  %v934_v22 = vld [vmem:[#allocation4 + $0x1010] sm:$0xff]  ;;  %v949_v24 = vld [vmem:[#allocation4 + $0x1088] sm:$0xff] }
 0x197   : > { %3560 = vmatprep.subr.mxu1 %v916_v25  ;;  %3526 = vmatpush3.msra.mxu0 %v868_v26  ;;  %v966_v23 = vld [vmem:[#allocation4 + $0x1110] sm:$0xff]  ;;  %v981_v25 = vld [vmem:[#allocation4 + $0x1188] sm:$0xff] }
 0x198   : > { %2173 = vmatprep.mubr.f32.mxu0 %v405_v27  ;;  %3561 = vmatpush3.msra.mxu1 %v900_v28  ;;  %v933_v26 = vld [vmem:[#allocation4 + $0x1008] sm:$0xff]  ;;  %v948_v28 = vld [vmem:[#allocation4 + $0x1080] sm:$0xff] }
 0x199   : > { %2243 = vmatprep.mubr.f32.mxu1 %v407_v29  ;;  %2174 = vmatmul.mubr.f32.vlgmr.msra.gmra.mxu0 %v404_v30  ;;  %v965_v27 = vld [vmem:[#allocation4 + $0x1108] sm:$0xff]  ;;  %v980_v29 = vld [vmem:[#allocation4 + $0x1180] sm:$0xff] }
 0x19a   : > { %2244 = vmatmul.mubr.f32.vlgmr.msra.gmra.mxu1 %v406_v31  ;;  %3565 = vmatprep.subr.mxu0 %v963_v32  ;;  %v932_v30 = vld [vmem:[#allocation4 + $0x1000] sm:$0xff]  ;;  %v409_v31 = vld [vmem:[%s4383_s27 + $0x108] sm:$0xff] }
 0x19b   : > { %3600 = vmatprep.subr.mxu1 %v995_v33  ;;  %3566 = vmatpush3.msra.mxu0 %v947_v34  ;;  %v964_v32 = vld [vmem:[#allocation4 + $0x1100] sm:$0xff]  ;;  %v411_v33 = vld [vmem:[%s4383_s27 + $0x118] sm:$0xff] }
 0x19c   : > { %3601 = vmatpush3.msra.mxu1 %v979_v35  ;;  %3567 = vmatprep.subr.mxu0 %v962_v36  ;;  %v408_v34 = vld [vmem:[%s4383_s27 + $0x100] sm:$0xff]  ;;  %v410_v35 = vld [vmem:[%s4383_s27 + $0x110] sm:$0xff]  ;;  %v1027_v36 = vld [vmem:[#allocation4 + $0x12f8] sm:$0xff] }
 0x19d   : > { %3602 = vmatprep.subr.mxu1 %v994_v37  ;;  %3568 = vmatpush3.msra.mxu0 %v946_v38  ;;  %v1059_v37 = vld [vmem:[#allocation4 + $0x13f8] sm:$0xff] }
 0x19e   : > { %3603 = vmatpush3.msra.mxu1 %v978_v39  ;;  %3569 = vmatprep.subr.mxu0 %v961_v40  ;;  %v1011_v38 = vld [vmem:[#allocation4 + $0x1278] sm:$0xff]  ;;  %v1026_v40 = vld [vmem:[#allocation4 + $0x12f0] sm:$0xff] }
 0x19f   : > { %3604 = vmatprep.subr.mxu1 %v993_v41  ;;  %3570 = vmatpush3.msra.mxu0 %v945_v42  ;;  %v1043_v39 = vld [vmem:[#allocation4 + $0x1378] sm:$0xff]  ;;  %v1058_v41 = vld [vmem:[#allocation4 + $0x13f0] sm:$0xff] }
 0x1a0   : > { %3605 = vmatpush3.msra.mxu1 %v977_v43  ;;  %3571 = vmatprep.subr.mxu0 %v960_v44  ;;  %v1010_v42 = vld [vmem:[#allocation4 + $0x1270] sm:$0xff]  ;;  %v1025_v44 = vld [vmem:[#allocation4 + $0x12e8] sm:$0xff] }
 0x1a1   : > { %3606 = vmatprep.subr.mxu1 %v992_v45  ;;  %3572 = vmatpush3.msra.mxu0 %v944_v46  ;;  %v1042_v43 = vld [vmem:[#allocation4 + $0x1370] sm:$0xff]  ;;  %v1057_v45 = vld [vmem:[#allocation4 + $0x13e8] sm:$0xff] }
 0x1a2   : > { %3607 = vmatpush3.msra.mxu1 %v976_v47  ;;  %3573 = vmatprep.subr.mxu0 %v959_v48  ;;  %v1009_v46 = vld [vmem:[#allocation4 + $0x1268] sm:$0xff]  ;;  %v1024_v48 = vld [vmem:[#allocation4 + $0x12e0] sm:$0xff] }
 0x1a3   : > { %3608 = vmatprep.subr.mxu1 %v991_v49  ;;  %3574 = vmatpush3.msra.mxu0 %v943_v50  ;;  %v1041_v47 = vld [vmem:[#allocation4 + $0x1368] sm:$0xff]  ;;  %v1056_v49 = vld [vmem:[#allocation4 + $0x13e0] sm:$0xff] }
 0x1a4   : > { %3609 = vmatpush3.msra.mxu1 %v975_v51  ;;  %3575 = vmatprep.subr.mxu0 %v958_v52  ;;  %v1008_v50 = vld [vmem:[#allocation4 + $0x1260] sm:$0xff]  ;;  %v1023_v52 = vld [vmem:[#allocation4 + $0x12d8] sm:$0xff] }
 0x1a5   : > { %3610 = vmatprep.subr.mxu1 %v990_v53  ;;  %3576 = vmatpush3.msra.mxu0 %v942_v54  ;;  %v1040_v51 = vld [vmem:[#allocation4 + $0x1360] sm:$0xff]  ;;  %v1055_v53 = vld [vmem:[#allocation4 + $0x13d8] sm:$0xff] }
 0x1a6   : > { %3611 = vmatpush3.msra.mxu1 %v974_v55  ;;  %3577 = vmatprep.subr.mxu0 %v957_v56  ;;  %v1007_v54 = vld [vmem:[#allocation4 + $0x1258] sm:$0xff]  ;;  %v1022_v56 = vld [vmem:[#allocation4 + $0x12d0] sm:$0xff] }
 0x1a7   : > { %3612 = vmatprep.subr.mxu1 %v989_v57  ;;  %3578 = vmatpush3.msra.mxu0 %v941_v58  ;;  %v1039_v55 = vld [vmem:[#allocation4 + $0x1358] sm:$0xff]  ;;  %v1054_v57 = vld [vmem:[#allocation4 + $0x13d0] sm:$0xff] }
 0x1a8   : > { %3613 = vmatpush3.msra.mxu1 %v973_v59  ;;  %3579 = vmatprep.subr.mxu0 %v956_v60  ;;  %v1006_v58 = vld [vmem:[#allocation4 + $0x1250] sm:$0xff]  ;;  %v1021_v60 = vld [vmem:[#allocation4 + $0x12c8] sm:$0xff] }
 0x1a9   : > { %3614 = vmatprep.subr.mxu1 %v988_v61  ;;  %3580 = vmatpush3.msra.mxu0 %v940_v62  ;;  %v1038_v59 = vld [vmem:[#allocation4 + $0x1350] sm:$0xff]  ;;  %v1053_v61 = vld [vmem:[#allocation4 + $0x13c8] sm:$0xff] }
 0x1aa   : > { %3615 = vmatpush3.msra.mxu1 %v972_v63  ;;  %3581 = vmatprep.subr.mxu0 %v955_v0  ;;  %v1005_v62 = vld [vmem:[#allocation4 + $0x1248] sm:$0xff]  ;;  %v1020_v0 = vld [vmem:[#allocation4 + $0x12c0] sm:$0xff] }
 0x1ab   : > { %3616 = vmatprep.subr.mxu1 %v987_v1  ;;  %3582 = vmatpush3.msra.mxu0 %v939_v2  ;;  %v1037_v63 = vld [vmem:[#allocation4 + $0x1348] sm:$0xff]  ;;  %v1052_v1 = vld [vmem:[#allocation4 + $0x13c0] sm:$0xff] }
 0x1ac   : > { %3617 = vmatpush3.msra.mxu1 %v971_v3  ;;  %3583 = vmatprep.subr.mxu0 %v954_v4  ;;  %v1004_v2 = vld [vmem:[#allocation4 + $0x1240] sm:$0xff]  ;;  %v1019_v4 = vld [vmem:[#allocation4 + $0x12b8] sm:$0xff] }
 0x1ad   : > { %3618 = vmatprep.subr.mxu1 %v986_v5  ;;  %3584 = vmatpush3.msra.mxu0 %v938_v6  ;;  %v1036_v3 = vld [vmem:[#allocation4 + $0x1340] sm:$0xff]  ;;  %v1051_v5 = vld [vmem:[#allocation4 + $0x13b8] sm:$0xff] }
 0x1ae   : > { %3619 = vmatpush3.msra.mxu1 %v970_v7  ;;  %3585 = vmatprep.subr.mxu0 %v953_v8  ;;  %v1003_v6 = vld [vmem:[#allocation4 + $0x1238] sm:$0xff]  ;;  %v1018_v8 = vld [vmem:[#allocation4 + $0x12b0] sm:$0xff] }
 0x1af   : > { %3620 = vmatprep.subr.mxu1 %v985_v9  ;;  %3586 = vmatpush3.msra.mxu0 %v937_v10  ;;  %v1035_v7 = vld [vmem:[#allocation4 + $0x1338] sm:$0xff]  ;;  %v1050_v9 = vld [vmem:[#allocation4 + $0x13b0] sm:$0xff] }
 0x1b0   : > { %3621 = vmatpush3.msra.mxu1 %v969_v11  ;;  %3587 = vmatprep.subr.mxu0 %v952_v12  ;;  %v1002_v10 = vld [vmem:[#allocation4 + $0x1230] sm:$0xff]  ;;  %v1017_v12 = vld [vmem:[#allocation4 + $0x12a8] sm:$0xff] }
 0x1b1   : > { %3622 = vmatprep.subr.mxu1 %v984_v13  ;;  %3588 = vmatpush3.msra.mxu0 %v936_v14  ;;  %v1034_v11 = vld [vmem:[#allocation4 + $0x1330] sm:$0xff]  ;;  %v1049_v13 = vld [vmem:[#allocation4 + $0x13a8] sm:$0xff] }
 0x1b2   : > { %3623 = vmatpush3.msra.mxu1 %v968_v15  ;;  %3589 = vmatprep.subr.mxu0 %v951_v16  ;;  %v1001_v14 = vld [vmem:[#allocation4 + $0x1228] sm:$0xff]  ;;  %v1016_v16 = vld [vmem:[#allocation4 + $0x12a0] sm:$0xff] }
 0x1b3   : > { %3624 = vmatprep.subr.mxu1 %v983_v17  ;;  %3590 = vmatpush3.msra.mxu0 %v935_v18  ;;  %v1033_v15 = vld [vmem:[#allocation4 + $0x1328] sm:$0xff]  ;;  %v1048_v17 = vld [vmem:[#allocation4 + $0x13a0] sm:$0xff] }
 0x1b4   : > { %3625 = vmatpush3.msra.mxu1 %v967_v19  ;;  %3591 = vmatprep.subr.mxu0 %v950_v20  ;;  %v1000_v18 = vld [vmem:[#allocation4 + $0x1220] sm:$0xff]  ;;  %v1015_v20 = vld [vmem:[#allocation4 + $0x1298] sm:$0xff] }
 0x1b5   : > { %3626 = vmatprep.subr.mxu1 %v982_v21  ;;  %3592 = vmatpush3.msra.mxu0 %v934_v22  ;;  %v1032_v19 = vld [vmem:[#allocation4 + $0x1320] sm:$0xff]  ;;  %v1047_v21 = vld [vmem:[#allocation4 + $0x1398] sm:$0xff] }
 0x1b6   : > { %3627 = vmatpush3.msra.mxu1 %v966_v23  ;;  %3593 = vmatprep.subr.mxu0 %v949_v24  ;;  %v999_v22 = vld [vmem:[#allocation4 + $0x1218] sm:$0xff]  ;;  %v1014_v24 = vld [vmem:[#allocation4 + $0x1290] sm:$0xff] }
 0x1b7   : > { %3628 = vmatprep.subr.mxu1 %v981_v25  ;;  %3594 = vmatpush3.msra.mxu0 %v933_v26  ;;  %v1031_v23 = vld [vmem:[#allocation4 + $0x1318] sm:$0xff]  ;;  %v1046_v25 = vld [vmem:[#allocation4 + $0x1390] sm:$0xff] }
 0x1b8   : > { %3629 = vmatpush3.msra.mxu1 %v965_v27  ;;  %3595 = vmatprep.subr.mxu0 %v948_v28  ;;  %v998_v26 = vld [vmem:[#allocation4 + $0x1210] sm:$0xff]  ;;  %v1013_v28 = vld [vmem:[#allocation4 + $0x1288] sm:$0xff] }
 0x1b9   : > { %3630 = vmatprep.subr.mxu1 %v980_v29  ;;  %3596 = vmatpush3.msra.mxu0 %v932_v30  ;;  %v1030_v27 = vld [vmem:[#allocation4 + $0x1310] sm:$0xff]  ;;  %v1045_v29 = vld [vmem:[#allocation4 + $0x1388] sm:$0xff] }
 0x1ba   : > { %2313 = vmatprep.mubr.f32.mxu0 %v409_v31  ;;  %3631 = vmatpush3.msra.mxu1 %v964_v32  ;;  %v997_v30 = vld [vmem:[#allocation4 + $0x1208] sm:$0xff]  ;;  %v1012_v32 = vld [vmem:[#allocation4 + $0x1280] sm:$0xff] }
 0x1bb   : > { %2383 = vmatprep.mubr.f32.mxu1 %v411_v33  ;;  %2314 = vmatmul.mubr.f32.vlgmr.msra.gmra.mxu0 %v408_v34  ;;  %v1029_v31 = vld [vmem:[#allocation4 + $0x1308] sm:$0xff]  ;;  %v1044_v33 = vld [vmem:[#allocation4 + $0x1380] sm:$0xff] }
 0x1bc   : > { %2384 = vmatmul.mubr.f32.vlgmr.msra.gmra.mxu1 %v410_v35  ;;  %3635 = vmatprep.subr.mxu0 %v1027_v36  ;;  %v996_v34 = vld [vmem:[#allocation4 + $0x1200] sm:$0xff]  ;;  %v413_v35 = vld [vmem:[%s4383_s27 + $0x128] sm:$0xff] }
 0x1bd   : > { %3670 = vmatprep.subr.mxu1 %v1059_v37  ;;  %3636 = vmatpush3.msra.mxu0 %v1011_v38  ;;  %v1028_v36 = vld [vmem:[#allocation4 + $0x1300] sm:$0xff]  ;;  %v415_v37 = vld [vmem:[%s4383_s27 + $0x138] sm:$0xff] }
 0x1be   : > { %3671 = vmatpush3.msra.mxu1 %v1043_v39  ;;  %3637 = vmatprep.subr.mxu0 %v1026_v40  ;;  %v412_v38 = vld [vmem:[%s4383_s27 + $0x120] sm:$0xff]  ;;  %v414_v39 = vld [vmem:[%s4383_s27 + $0x130] sm:$0xff]  ;;  %v1091_v40 = vld [vmem:[#allocation4 + $0x14f8] sm:$0xff] }
 0x1bf   : > { %3672 = vmatprep.subr.mxu1 %v1058_v41  ;;  %3638 = vmatpush3.msra.mxu0 %v1010_v42  ;;  %v1075_v41 = vld [vmem:[#allocation4 + $0x1478] sm:$0xff] }
 0x1c0   : > { %3673 = vmatpush3.msra.mxu1 %v1042_v43  ;;  %3639 = vmatprep.subr.mxu0 %v1025_v44  ;;  %v1107_v42 = vld [vmem:[#allocation4 + $0x1578] sm:$0xff]  ;;  %v1090_v43 = vld [vmem:[#allocation4 + $0x14f0] sm:$0xff]  ;;  %v4192_v44 = vmov 0.0  }
 0x1c1   : > { %3674 = vmatprep.subr.mxu1 %v1057_v45  ;;  %3640 = vmatpush3.msra.mxu0 %v1009_v46  ;;  %v1074_v45 = vld [vmem:[#allocation4 + $0x1470] sm:$0xff] }
 0x1c2   : > { %3675 = vmatpush3.msra.mxu1 %v1041_v47  ;;  %3641 = vmatprep.subr.mxu0 %v1024_v48  ;;  %v1106_v46 = vld [vmem:[#allocation4 + $0x1570] sm:$0xff]  ;;  %v1089_v47 = vld [vmem:[#allocation4 + $0x14e8] sm:$0xff] }
 0x1c3   : > { %3676 = vmatprep.subr.mxu1 %v1056_v49  ;;  %3642 = vmatpush3.msra.mxu0 %v1008_v50  ;;  %v1073_v48 = vld [vmem:[#allocation4 + $0x1468] sm:$0xff]  ;;  %v1088_v50 = vld [vmem:[#allocation4 + $0x14e0] sm:$0xff] }
 0x1c4   : > { %3677 = vmatpush3.msra.mxu1 %v1040_v51  ;;  %3643 = vmatprep.subr.mxu0 %v1023_v52  ;;  %v1105_v49 = vld [vmem:[#allocation4 + $0x1568] sm:$0xff]  ;;  %v1072_v51 = vld [vmem:[#allocation4 + $0x1460] sm:$0xff] }
 0x1c5   : > { %3678 = vmatprep.subr.mxu1 %v1055_v53  ;;  %3644 = vmatpush3.msra.mxu0 %v1007_v54  ;;  %v1104_v52 = vld [vmem:[#allocation4 + $0x1560] sm:$0xff]  ;;  %v1087_v53 = vld [vmem:[#allocation4 + $0x14d8] sm:$0xff] }
 0x1c6   : > { %3679 = vmatpush3.msra.mxu1 %v1039_v55  ;;  %3645 = vmatprep.subr.mxu0 %v1022_v56  ;;  %v1071_v54 = vld [vmem:[#allocation4 + $0x1458] sm:$0xff]  ;;  %v1086_v56 = vld [vmem:[#allocation4 + $0x14d0] sm:$0xff] }
 0x1c7   : > { %3680 = vmatprep.subr.mxu1 %v1054_v57  ;;  %3646 = vmatpush3.msra.mxu0 %v1006_v58  ;;  %v1103_v55 = vld [vmem:[#allocation4 + $0x1558] sm:$0xff]  ;;  %v1070_v57 = vld [vmem:[#allocation4 + $0x1450] sm:$0xff] }
 0x1c8   : > { %3681 = vmatpush3.msra.mxu1 %v1038_v59  ;;  %3647 = vmatprep.subr.mxu0 %v1021_v60  ;;  %v1102_v58 = vld [vmem:[#allocation4 + $0x1550] sm:$0xff]  ;;  %v1085_v59 = vld [vmem:[#allocation4 + $0x14c8] sm:$0xff] }
 0x1c9   : > { %3682 = vmatprep.subr.mxu1 %v1053_v61  ;;  %3648 = vmatpush3.msra.mxu0 %v1005_v62  ;;  %v1069_v60 = vld [vmem:[#allocation4 + $0x1448] sm:$0xff]  ;;  %v1084_v62 = vld [vmem:[#allocation4 + $0x14c0] sm:$0xff] }
 0x1ca   : > { %3683 = vmatpush3.msra.mxu1 %v1037_v63  ;;  %3649 = vmatprep.subr.mxu0 %v1020_v0  ;;  %v1101_v61 = vld [vmem:[#allocation4 + $0x1548] sm:$0xff]  ;;  %v1068_v63 = vld [vmem:[#allocation4 + $0x1440] sm:$0xff] }
 0x1cb   : > { %3684 = vmatprep.subr.mxu1 %v1052_v1  ;;  %3650 = vmatpush3.msra.mxu0 %v1004_v2  ;;  %v1100_v0 = vld [vmem:[#allocation4 + $0x1540] sm:$0xff]  ;;  %v1083_v1 = vld [vmem:[#allocation4 + $0x14b8] sm:$0xff] }
 0x1cc   : > { %3685 = vmatpush3.msra.mxu1 %v1036_v3  ;;  %3651 = vmatprep.subr.mxu0 %v1019_v4  ;;  %v1067_v2 = vld [vmem:[#allocation4 + $0x1438] sm:$0xff]  ;;  %v1082_v4 = vld [vmem:[#allocation4 + $0x14b0] sm:$0xff] }
 0x1cd   : > { %3686 = vmatprep.subr.mxu1 %v1051_v5  ;;  %3652 = vmatpush3.msra.mxu0 %v1003_v6  ;;  %v1099_v3 = vld [vmem:[#allocation4 + $0x1538] sm:$0xff]  ;;  %v1066_v5 = vld [vmem:[#allocation4 + $0x1430] sm:$0xff] }
 0x1ce   : > { %3687 = vmatpush3.msra.mxu1 %v1035_v7  ;;  %3653 = vmatprep.subr.mxu0 %v1018_v8  ;;  %v1098_v6 = vld [vmem:[#allocation4 + $0x1530] sm:$0xff]  ;;  %v1081_v7 = vld [vmem:[#allocation4 + $0x14a8] sm:$0xff] }
 0x1cf   : > { %3688 = vmatprep.subr.mxu1 %v1050_v9  ;;  %3654 = vmatpush3.msra.mxu0 %v1002_v10  ;;  %v1065_v8 = vld [vmem:[#allocation4 + $0x1428] sm:$0xff]  ;;  %v1080_v10 = vld [vmem:[#allocation4 + $0x14a0] sm:$0xff] }
 0x1d0   : > { %3689 = vmatpush3.msra.mxu1 %v1034_v11  ;;  %3655 = vmatprep.subr.mxu0 %v1017_v12  ;;  %v1097_v9 = vld [vmem:[#allocation4 + $0x1528] sm:$0xff]  ;;  %v1064_v11 = vld [vmem:[#allocation4 + $0x1420] sm:$0xff] }
 0x1d1   : > { %3690 = vmatprep.subr.mxu1 %v1049_v13  ;;  %3656 = vmatpush3.msra.mxu0 %v1001_v14  ;;  %v1096_v12 = vld [vmem:[#allocation4 + $0x1520] sm:$0xff]  ;;  %v1079_v13 = vld [vmem:[#allocation4 + $0x1498] sm:$0xff] }
 0x1d2   : > { %3691 = vmatpush3.msra.mxu1 %v1033_v15  ;;  %3657 = vmatprep.subr.mxu0 %v1016_v16  ;;  %v1063_v14 = vld [vmem:[#allocation4 + $0x1418] sm:$0xff]  ;;  %v1078_v16 = vld [vmem:[#allocation4 + $0x1490] sm:$0xff] }
 0x1d3   : > { %3692 = vmatprep.subr.mxu1 %v1048_v17  ;;  %3658 = vmatpush3.msra.mxu0 %v1000_v18  ;;  %v1095_v15 = vld [vmem:[#allocation4 + $0x1518] sm:$0xff]  ;;  %v1062_v17 = vld [vmem:[#allocation4 + $0x1410] sm:$0xff] }
 0x1d4   : > { %3693 = vmatpush3.msra.mxu1 %v1032_v19  ;;  %3659 = vmatprep.subr.mxu0 %v1015_v20  ;;  %v1094_v18 = vld [vmem:[#allocation4 + $0x1510] sm:$0xff]  ;;  %v1077_v19 = vld [vmem:[#allocation4 + $0x1488] sm:$0xff] }
 0x1d5   : > { %3694 = vmatprep.subr.mxu1 %v1047_v21  ;;  %3660 = vmatpush3.msra.mxu0 %v999_v22  ;;  %v1061_v20 = vld [vmem:[#allocation4 + $0x1408] sm:$0xff]  ;;  %v1076_v22 = vld [vmem:[#allocation4 + $0x1480] sm:$0xff] }
 0x1d6   : > { %3695 = vmatpush3.msra.mxu1 %v1031_v23  ;;  %3661 = vmatprep.subr.mxu0 %v1014_v24  ;;  %v1093_v21 = vld [vmem:[#allocation4 + $0x1508] sm:$0xff]  ;;  %v1060_v23 = vld [vmem:[#allocation4 + $0x1400] sm:$0xff] }
 0x1d7   : > { %3696 = vmatprep.subr.mxu1 %v1046_v25  ;;  %3662 = vmatpush3.msra.mxu0 %v998_v26  ;;  %v417_v24 = vld [vmem:[%s4383_s27 + $0x148] sm:$0xff]  ;;  %v1092_v25 = vld [vmem:[#allocation4 + $0x1500] sm:$0xff] }
 0x1d8   : > { %3697 = vmatpush3.msra.mxu1 %v1030_v27  ;;  %3663 = vmatprep.subr.mxu0 %v1013_v28  ;;  %v416_v26 = vld [vmem:[%s4383_s27 + $0x140] sm:$0xff]  ;;  %v419_v27 = vld [vmem:[%s4383_s27 + $0x158] sm:$0xff]  ;;  %v1113_v28 = vld [vmem:[#allocation4 + $0x15a8] sm:$0x3f] }
 0x1d9   : > { %3698 = vmatprep.subr.mxu1 %v1045_v29  ;;  %3664 = vmatpush3.msra.mxu0 %v997_v30  ;;  %v1112_v29 = vld [vmem:[#allocation4 + $0x15a0] sm:$0xff]  ;;  %v1111_v30 = vld [vmem:[#allocation4 + $0x1598] sm:$0xff] }
 0x1da   : > { %3699 = vmatpush3.msra.mxu1 %v1029_v31  ;;  %3665 = vmatprep.subr.mxu0 %v1012_v32  ;;  %v1110_v31 = vld [vmem:[#allocation4 + $0x1590] sm:$0xff]  ;;  %v1109_v32 = vld [vmem:[#allocation4 + $0x1588] sm:$0xff] }
 0x1db   : > { %3700 = vmatprep.subr.mxu1 %v1044_v33  ;;  %3666 = vmatpush3.msra.mxu0 %v996_v34  ;;  %v1108_v33 = vld [vmem:[#allocation4 + $0x1580] sm:$0xff]  ;;  %v418_v34 = vld [vmem:[%s4383_s27 + $0x150] sm:$0xff] }
 0x1dc   : > { %2453 = vmatprep.mubr.f32.mxu0 %v413_v35  ;;  %3701 = vmatpush3.msra.mxu1 %v1028_v36  ;;  %v2685_v35 = vld [vmem:[#allocation7 + $0x78] sm:$0xff]  ;;  %v2684_v36 = vld [vmem:[#allocation7 + $0x70] sm:$0xff] }
 0x1dd   : > { %2523 = vmatprep.mubr.f32.mxu1 %v415_v37  ;;  %2454 = vmatmul.mubr.f32.vlgmr.msra.gmra.mxu0 %v412_v38  ;;  %v2683_v37 = vld [vmem:[#allocation7 + $0x68] sm:$0xff]  ;;  %v2682_v38 = vld [vmem:[#allocation7 + $0x60] sm:$0xff] }
 0x1de   : > { %2524 = vmatmul.mubr.f32.vlgmr.msra.gmra.mxu1 %v414_v39  ;;  %3705 = vmatprep.subr.mxu0 %v1091_v40  ;;  %v2681_v39 = vld [vmem:[#allocation7 + $0x58] sm:$0xff]  ;;  %v2680_v40 = vld [vmem:[#allocation7 + $0x50] sm:$0xff] }
 0x1df   : > { %2599 = vmatprep.subr.mxu1 %v4192_v44  ;;  %3706 = vmatpush3.msra.mxu0 %v1075_v41  ;;  %v2679_v41 = vld [vmem:[#allocation7 + $0x48] sm:$0xff] }
 0x1e0   : > { %2600 = vmatpush1.msra.mxu1 %v1107_v42  ;;  %3707 = vmatprep.subr.mxu0 %v1090_v43  ;;  %v2678_v42 = vld [vmem:[#allocation7 + $0x40] sm:$0xff]  ;;  %v2677_v43 = vld [vmem:[#allocation7 + $0x38] sm:$0xff] }
 0x1e1   : > { %2601 = vmatprep.subr.mxu1 %v4192_v44  ;;  %3708 = vmatpush3.msra.mxu0 %v1074_v45  ;;  %v2676_v45 = vld [vmem:[#allocation7 + $0x30] sm:$0xff] }
 0x1e2   : > { %2602 = vmatpush1.msra.mxu1 %v1106_v46  ;;  %3709 = vmatprep.subr.mxu0 %v1089_v47  ;;  %v2675_v46 = vld [vmem:[#allocation7 + $0x28] sm:$0xff]  ;;  %v2674_v47 = vld [vmem:[#allocation7 + $0x20] sm:$0xff] }
 0x1e3   : > { %2603 = vmatprep.subr.mxu1 %v4192_v44  ;;  %3710 = vmatpush3.msra.mxu0 %v1073_v48  ;;  %v2673_v48 = vld [vmem:[#allocation7 + $0x18] sm:$0xff] }
 0x1e4   : > { %2604 = vmatpush1.msra.mxu1 %v1105_v49  ;;  %3711 = vmatprep.subr.mxu0 %v1088_v50  ;;  %v2672_v49 = vld [vmem:[#allocation7 + $0x10] sm:$0xff]  ;;  %v2671_v50 = vld [vmem:[#allocation7 + $0x8] sm:$0xff] }
 0x1e5   : > { %2605 = vmatprep.subr.mxu1 %v4192_v44  ;;  %3712 = vmatpush3.msra.mxu0 %v1072_v51  ;;  %v2670_v51 = vld [vmem:[#allocation7] sm:$0xff] }
 0x1e6   : > { %2606 = vmatpush1.msra.mxu1 %v1104_v52  ;;  %3713 = vmatprep.subr.mxu0 %v1087_v53  ;;  %v2779_v52 = vld [vmem:[#allocation10 + $0x78] sm:$0xff]  ;;  %v2778_v53 = vld [vmem:[#allocation10 + $0x70] sm:$0xff] }
 0x1e7   : > { %2607 = vmatprep.subr.mxu1 %v4192_v44  ;;  %3714 = vmatpush3.msra.mxu0 %v1071_v54  ;;  %v2777_v54 = vld [vmem:[#allocation10 + $0x68] sm:$0xff] }
 0x1e8   : > { %2608 = vmatpush1.msra.mxu1 %v1103_v55  ;;  %3715 = vmatprep.subr.mxu0 %v1086_v56  ;;  %v2776_v55 = vld [vmem:[#allocation10 + $0x60] sm:$0xff]  ;;  %v2775_v56 = vld [vmem:[#allocation10 + $0x58] sm:$0xff] }
 0x1e9   : > { %2609 = vmatprep.subr.mxu1 %v4192_v44  ;;  %3716 = vmatpush3.msra.mxu0 %v1070_v57  ;;  %v2774_v57 = vld [vmem:[#allocation10 + $0x50] sm:$0xff] }
 0x1ea   : > { %2610 = vmatpush1.msra.mxu1 %v1102_v58  ;;  %3717 = vmatprep.subr.mxu0 %v1085_v59  ;;  %v2773_v58 = vld [vmem:[#allocation10 + $0x48] sm:$0xff]  ;;  %v2772_v59 = vld [vmem:[#allocation10 + $0x40] sm:$0xff] }
 0x1eb   : > { %2611 = vmatprep.subr.mxu1 %v4192_v44  ;;  %3718 = vmatpush3.msra.mxu0 %v1069_v60  ;;  %v2771_v60 = vld [vmem:[#allocation10 + $0x38] sm:$0xff] }
 0x1ec   : > { %2612 = vmatpush1.msra.mxu1 %v1101_v61  ;;  %3719 = vmatprep.subr.mxu0 %v1084_v62  ;;  %v2770_v61 = vld [vmem:[#allocation10 + $0x30] sm:$0xff]  ;;  %v2769_v62 = vld [vmem:[#allocation10 + $0x28] sm:$0xff] }
 0x1ed   : > { %2613 = vmatprep.subr.mxu1 %v4192_v44  ;;  %3720 = vmatpush3.msra.mxu0 %v1068_v63  ;;  %v2768_v63 = vld [vmem:[#allocation10 + $0x20] sm:$0xff] }
 0x1ee   : > { %2614 = vmatpush1.msra.mxu1 %v1100_v0  ;;  %3721 = vmatprep.subr.mxu0 %v1083_v1  ;;  %v2767_v0 = vld [vmem:[#allocation10 + $0x18] sm:$0xff]  ;;  %v3037_v1 = vpop.f32.mrf.mxu0 }
 0x1ef   : > { %2615 = vmatprep.subr.mxu1 %v4192_v44  ;;  %3722 = vmatpush3.msra.mxu0 %v1067_v2 }
 0x1f0   : > { %2616 = vmatpush1.msra.mxu1 %v1099_v3  ;;  %3723 = vmatprep.subr.mxu0 %v1082_v4  ;;  %v3038_v2 = vpop.f32.mrf.mxu0  ;;  %v3072_v3 = vpop.f32.mrf.mxu1 }
 0x1f1   : > { %2617 = vmatprep.subr.mxu1 %v4192_v44  ;;  %3724 = vmatpush3.msra.mxu0 %v1066_v5  ;;  %v3039_v5 = vadd.f32 %v3038_v2, %v3037_v1 }
 0x1f2   : > { %2618 = vmatpush1.msra.mxu1 %v1098_v6  ;;  %3725 = vmatprep.subr.mxu0 %v1081_v7  ;;  %v3107_v4 = vpop.f32.mrf.mxu0  ;;  %v2998_v6 = vld [vmem:[#allocation6] ss:$0 sm:$0xff]  ;;  %v3073_v7 = vpop.f32.mrf.mxu1 }
 0x1f3   : > { %2619 = vmatprep.subr.mxu1 %v4192_v44  ;;  %3726 = vmatpush3.msra.mxu0 %v1065_v8 }
 0x1f4   : > { %2620 = vmatpush1.msra.mxu1 %v1097_v9  ;;  %3727 = vmatprep.subr.mxu0 %v1080_v10  ;;  %v3108_v8 = vpop.f32.mrf.mxu0  ;;  %v1196_v9 = vadd.f32 %v3039_v5, %v2998_v6  ;;  %v3142_v10 = vpop.f32.mrf.mxu1 }
 0x1f5   : > { %2621 = vmatprep.subr.mxu1 %v4192_v44  ;;  %3728 = vmatpush3.msra.mxu0 %v1064_v11 }
 0x1f6   : > { %2622 = vmatpush1.msra.mxu1 %v1096_v12  ;;  %3729 = vmatprep.subr.mxu0 %v1079_v13  ;;  %v3177_v11 = vpop.f32.mrf.mxu0  ;;  %v3074_v12 = vadd.f32 %v3073_v7, %v3072_v3  ;;  %v3109_v13 = vadd.f32 %v3108_v8, %v3107_v4 }
 0x1f7   : > { %2623 = vmatprep.subr.mxu1 %v4192_v44  ;;  %3730 = vmatpush3.msra.mxu0 %v1063_v14 }
 0x1f8   : > { %2624 = vmatpush1.msra.mxu1 %v1095_v15  ;;  %3731 = vmatprep.subr.mxu0 %v1078_v16  ;;  %v1266_v14 = vadd.f32 %v3074_v12, %v1196_v9  ;;  %v3143_v15 = vpop.f32.mrf.mxu1  ;;  %v3178_v16 = vpop.f32.mrf.mxu0 }
 0x1f9   : > { %2625 = vmatprep.subr.mxu1 %v4192_v44  ;;  %3732 = vmatpush3.msra.mxu0 %v1062_v17 }
 0x1fa   : > { %2626 = vmatpush1.msra.mxu1 %v1094_v18  ;;  %3733 = vmatprep.subr.mxu0 %v1077_v19  ;;  %v1336_v17 = vadd.f32 %v3109_v13, %v1266_v14  ;;  %v3212_v18 = vpop.f32.mrf.mxu1  ;;  %v3247_v19 = vpop.f32.mrf.mxu0 }
 0x1fb   : > { %2627 = vmatprep.subr.mxu1 %v4192_v44  ;;  %3734 = vmatpush3.msra.mxu0 %v1061_v20  ;;  %v3144_v20 = vadd.f32 %v3143_v15, %v3142_v10 }
 0x1fc   : > { %2628 = vmatpush1.msra.mxu1 %v1093_v21  ;;  %3735 = vmatprep.subr.mxu0 %v1076_v22  ;;  %v3179_v21 = vadd.f32 %v3178_v16, %v3177_v11 }
 0x1fd   : > { %2629 = vmatprep.subr.mxu1 %v4192_v44  ;;  %3736 = vmatpush3.msra.mxu0 %v1060_v23  ;;  %v1406_v22 = vadd.f32 %v3144_v20, %v1336_v17  ;;  %v3213_v23 = vpop.f32.mrf.mxu1 }
 0x1fe   : > { %2593 = vmatprep.mubr.f32.mxu0 %v417_v24  ;;  %2630 = vmatpush1.msra.mxu1 %v1092_v25  ;;  %v3248_v24 = vpop.f32.mrf.mxu0 }
 0x1ff   : > { %2594 = vmatmul.mubr.f32.vlgmr.msra.gmra.mxu0 %v416_v26  ;;  %2651 = vmatprep.subr.mxu1 %v4192_v44  ;;  %v1476_v25 = vadd.f32 %v3179_v21, %v1406_v22  ;;  %v3282_v26 = vpop.f32.mrf.mxu1 }
 0x200   : > { %3000 = vmatprep.mubr.msk.f32.mxu1 %vm1121_vm0, %v419_v27  ;;  %2999 = vmatpush2.msk.msra.mxu1 %vm1125_vm1, %v1113_v28  ;;  %v3317_v27 = vpop.f32.mrf.mxu0  ;;  %v3214_v28 = vadd.f32 %v3213_v23, %v3212_v18 }
 0x201   : > { %3774 = vmatprep.subr.mxu0 %v4192_v44  ;;  %2653 = vmatprep.subr.mxu1 %v4192_v44 }
 0x202   : > { %2654 = vmatpush2.msra.mxu1 %v1112_v29  ;;  %3775 = vmatpush3.msra.mxu0 %v2685_v35  ;;  %v3249_v29 = vadd.f32 %v3248_v24, %v3247_v19 }
 0x203   : > { %2655 = vmatprep.subr.mxu1 %v4192_v44  ;;  %3776 = vmatprep.subr.mxu0 %v4192_v44 }
 0x204   : > { %2656 = vmatpush2.msra.mxu1 %v1111_v30  ;;  %3777 = vmatpush3.msra.mxu0 %v2684_v36  ;;  %v1546_v30 = vadd.f32 %v3214_v28, %v1476_v25  ;;  %v2765_v28 = vld [vmem:[#allocation10 + $0x8] sm:$0xff] }
 0x205   : > { %2657 = vmatprep.subr.mxu1 %v4192_v44  ;;  %3778 = vmatprep.subr.mxu0 %v4192_v44 }
 0x206   : > { %2658 = vmatpush2.msra.mxu1 %v1110_v31  ;;  %3779 = vmatpush3.msra.mxu0 %v2683_v37  ;;  %v3283_v31 = vpop.f32.mrf.mxu1 }
 0x207   : > { %2659 = vmatprep.subr.mxu1 %v4192_v44  ;;  %3780 = vmatprep.subr.mxu0 %v4192_v44  ;;  %v3284_v36 = vadd.f32 %v3283_v31, %v3282_v26 }
 0x208   : > { %2660 = vmatpush2.msra.mxu1 %v1109_v32  ;;  %3781 = vmatpush3.msra.mxu0 %v2682_v38  ;;  %v3318_v32 = vpop.f32.mrf.mxu0 }
 0x209   : > { %2661 = vmatprep.subr.mxu1 %v4192_v44  ;;  %3782 = vmatprep.subr.mxu0 %v4192_v44  ;;  %v3319_v37 = vadd.f32 %v3318_v32, %v3317_v27  ;;  %v2766_v27 = vld [vmem:[#allocation10 + $0x10] sm:$0xff] }
 0x20a   : > { %2662 = vmatpush2.msra.mxu1 %v1108_v33  ;;  %3783 = vmatpush3.msra.mxu0 %v2681_v39  ;;  %v1616_v33 = vadd.f32 %v3249_v29, %v1546_v30  ;;  %v2764_v29 = vld [vmem:[#allocation10] sm:$0xff]  ;;  %v3001_v30 = vld [vmem:[#allocation9] ss:$0 sm:$0xff] }
 0x20b   : > { %2664 = vmatmul.mubr.f32.vlgmr.msra.gmra.mxu1 %v418_v34  ;;  %3809 = vmatprep.subr.mxu1 %v4192_v44  ;;  %v3352_v34 = vpop.f32.mrf.mxu1 }
 0x20c   : > { %3784 = vmatprep.subr.mxu0 %v4192_v44  ;;  %3806 = vmatprep.mubr.msk.f32.mxu0 %vm4193_vm2, %v4192_v44  ;;  %v1686_v38 = vadd.f32 %v3284_v36, %v1616_v33 }
 0x20d   : > { %3785 = vmatpush3.msra.mxu0 %v2680_v40  ;;  %3841 = vmatprep.mubr.msk.f32.mxu1 %vm4193_vm2, %v4192_v44  ;;  %v3353_v39 = vpop.f32.mrf.mxu1 }
 0x20e   : > { %3786 = vmatprep.subr.mxu0 %v4192_v44  ;;  %3810 = vmatpush3.msra.mxu1 %v2779_v52 }
 0x20f   : > { %3787 = vmatpush3.msra.mxu0 %v2679_v41  ;;  %3811 = vmatprep.subr.mxu1 %v4192_v44  ;;  %v1756_v41 = vadd.f32 %v3319_v37, %v1686_v38 }
 0x210   : > { %3788 = vmatprep.subr.mxu0 %v4192_v44  ;;  %3812 = vmatpush3.msra.mxu1 %v2778_v53 }
 0x211   : > { %3789 = vmatpush3.msra.mxu0 %v2678_v42  ;;  %3813 = vmatprep.subr.mxu1 %v4192_v44 }
 0x212   : > { %3790 = vmatprep.subr.mxu0 %v4192_v44  ;;  %3814 = vmatpush3.msra.mxu1 %v2777_v54 }
 0x213   : > { %3791 = vmatpush3.msra.mxu0 %v2677_v43  ;;  %3815 = vmatprep.subr.mxu1 %v4192_v44 }
 0x214   : > { %3792 = vmatprep.subr.mxu0 %v4192_v44  ;;  %3816 = vmatpush3.msra.mxu1 %v2776_v55 }
 0x215   : > { %3793 = vmatpush3.msra.mxu0 %v2676_v45  ;;  %3817 = vmatprep.subr.mxu1 %v4192_v44  ;;  %v3387_v35 = vpop.f32.mrf.mxu0  ;;  %v3354_v45 = vadd.f32 %v3353_v39, %v3352_v34 }
 0x216   : > { %3794 = vmatprep.subr.mxu0 %v4192_v44  ;;  %3818 = vmatpush3.msra.mxu1 %v2775_v56  ;;  %v3422_v42 = vpop.f32.mrf.mxu1 }
 0x217   : > { %3795 = vmatpush3.msra.mxu0 %v2675_v46  ;;  %3819 = vmatprep.subr.mxu1 %v4192_v44  ;;  %v3388_v40 = vpop.f32.mrf.mxu0 }
 0x218   : > { %3796 = vmatprep.subr.mxu0 %v4192_v44  ;;  %3820 = vmatpush3.msra.mxu1 %v2774_v57  ;;  %v3389_v46 = vadd.f32 %v3388_v40, %v3387_v35  ;;  %v3002_v35 = vld [vmem:[#allocation12] ss:$0 sm:$0xff] }
 0x219   : > { %3797 = vmatpush3.msra.mxu0 %v2674_v47  ;;  %3821 = vmatprep.subr.mxu1 %v4192_v44  ;;  %v1826_v47 = vadd.f32 %v3354_v45, %v1756_v41 }
 0x21a   : > { %3798 = vmatprep.subr.mxu0 %v4192_v44  ;;  %3822 = vmatpush3.msra.mxu1 %v2773_v58 }
 0x21b   : > { %3799 = vmatpush3.msra.mxu0 %v2673_v48  ;;  %3823 = vmatprep.subr.mxu1 %v4192_v44  ;;  %v3423_v48 = vpop.f32.mrf.mxu1 }
 0x21c   : > { %3800 = vmatprep.subr.mxu0 %v4192_v44  ;;  %3824 = vmatpush3.msra.mxu1 %v2772_v59  ;;  %v3424_v53 = vadd.f32 %v3423_v48, %v3422_v42 }
 0x21d   : > { %3801 = vmatpush3.msra.mxu0 %v2672_v49  ;;  %3825 = vmatprep.subr.mxu1 %v4192_v44 }
 0x21e   : > { %3802 = vmatprep.subr.mxu0 %v4192_v44  ;;  %3826 = vmatpush3.msra.mxu1 %v2771_v60 }
 0x21f   : > { %3803 = vmatpush3.msra.mxu0 %v2671_v50  ;;  %3827 = vmatprep.subr.mxu1 %v4192_v44  ;;  %v1896_v50 = vadd.f32 %v3389_v46, %v1826_v47 }
 0x220   : > { %3804 = vmatprep.subr.mxu0 %v4192_v44  ;;  %3828 = vmatpush3.msra.mxu1 %v2770_v61 }
 0x221   : > { %3805 = vmatpush3.msra.mxu0 %v2670_v51  ;;  %3829 = vmatprep.subr.mxu1 %v4192_v44  ;;  %v1966_v55 = vadd.f32 %v3424_v53, %v1896_v50 }
 0x222   : > { %3830 = vmatpush3.msra.mxu1 %v2769_v62 }
 0x223   : > { %3831 = vmatprep.subr.mxu1 %v4192_v44 }
 0x224   : > { %3832 = vmatpush3.msra.mxu1 %v2768_v63 }
 0x225   : > { %3833 = vmatprep.subr.mxu1 %v4192_v44 }
 0x226   : > { %3834 = vmatpush3.msra.mxu1 %v2767_v0 }
 0x227   : > { %3835 = vmatprep.subr.mxu1 %v4192_v44 }
 0x228   : > { %3836 = vmatpush3.msra.mxu1 %v2766_v27 }
 0x229   : > { %3837 = vmatprep.subr.mxu1 %v4192_v44 }
 0x22a   : > { %3838 = vmatpush3.msra.mxu1 %v2765_v28 }
 0x22b   : > { %3839 = vmatprep.subr.mxu1 %v4192_v44 }
 0x22c   : > { %3840 = vmatpush3.msra.mxu1 %v2764_v29 }
 0x237   : > { %v3457_v43 = vpop.f32.mrf.mxu0 }
 0x238   : > { %v3492_v51 = vpop.f32.mrf.mxu1 }
 0x239   : > { %v3458_v49 = vpop.f32.mrf.mxu0 }
 0x23a   : > { %v3459_v54 = vadd.f32 %v3458_v49, %v3457_v43  ;;  %v3493_v56 = vpop.f32.mrf.mxu1 }
 0x23b   : > { %v3494_v61 = vadd.f32 %v3493_v56, %v3492_v51 }
 0x23c   : > { %v2036_v58 = vadd.f32 %v3459_v54, %v1966_v55 }
 0x23e   : > { %v2106_v63 = vadd.f32 %v3494_v61, %v2036_v58 }
 0x259   : > { %v3527_v52 = vpop.f32.mrf.mxu0 }
 0x25a   : > { %v3562_v59 = vpop.f32.mrf.mxu1 }
 0x25b   : > { %v3528_v57 = vpop.f32.mrf.mxu0 }
 0x25c   : > { %v3529_v62 = vadd.f32 %v3528_v57, %v3527_v52  ;;  %v3563_v0 = vpop.f32.mrf.mxu1 }
 0x25d   : > { %v3564_v5 = vadd.f32 %v3563_v0, %v3562_v59 }
 0x25e   : > { %v2176_v2 = vadd.f32 %v3529_v62, %v2106_v63 }
 0x260   : > { %v2246_v7 = vadd.f32 %v3564_v5, %v2176_v2 }
 0x27b   : > { %v3597_v60 = vpop.f32.mrf.mxu0 }
 0x27c   : > { %v3632_v3 = vpop.f32.mrf.mxu1 }
 0x27d   : > { %v3598_v1 = vpop.f32.mrf.mxu0 }
 0x27e   : > { %v3599_v6 = vadd.f32 %v3598_v1, %v3597_v60  ;;  %v3633_v8 = vpop.f32.mrf.mxu1 }
 0x27f   : > { %v3634_v13 = vadd.f32 %v3633_v8, %v3632_v3 }
 0x280   : > { %v2316_v10 = vadd.f32 %v3599_v6, %v2246_v7 }
 0x282   : > { %v2386_v15 = vadd.f32 %v3634_v13, %v2316_v10 }
 0x29d   : > { %v3667_v4 = vpop.f32.mrf.mxu0 }
 0x29e   : > { %v3702_v11 = vpop.f32.mrf.mxu1 }
 0x29f   : > { %v3668_v9 = vpop.f32.mrf.mxu0 }
 0x2a0   : > { %v3669_v14 = vadd.f32 %v3668_v9, %v3667_v4  ;;  %v3703_v16 = vpop.f32.mrf.mxu1 }
 0x2a1   : > { %v3704_v19 = vadd.f32 %v3703_v16, %v3702_v11 }
 0x2a2   : > { %v2456_v18 = vadd.f32 %v3669_v14, %v2386_v15 }
 0x2a4   : > { %v2526_v21 = vadd.f32 %v3704_v19, %v2456_v18 }
 0x2bf   : > { %v3737_v12 = vpop.f32.mrf.mxu0 }
 0x2c1   : > { %v3738_v17 = vpop.f32.mrf.mxu0 }
 0x2c2   : > { %v3739_v20 = vadd.f32 %v3738_v17, %v3737_v12 }
 0x2c4   : > { %v2596_v22 = vadd.f32 %v3739_v20, %v2526_v21 }
 0x2cb   : > { %v2665_v23 = vpop.f32.mrf.mxu1 }
 0x2cc   : > { %v2666_v24 = vadd.f32 %v2665_v23, %v2596_v22 }
 0x2cd   : > { %v2667_v25 = vpop.f32.mrf.mxu1 }
 0x2ce   : > { %v2669_v26 = vmax.f32 %v2666_v24, 0.0 }
 0x2d0   : > { %3807 = vmatmul.mubr.f32.vlgmr.msra.gmra.mxu0 %v2669_v26 }
 0x390   : > { %v2759_v31 = vpop.f32.mrf.mxu0 }
 0x391   : > { %v2760_v32 = vadd.f32 %v3001_v30, %v2759_v31 }
 0x392   : > { %v3808_v33 = vpop.f32.mrf.mxu0 }
 0x393   : > { %v2763_v34 = vmax.f32 %v2760_v32, 0.0 }
 0x395   : > { %3842 = vmatmul.mubr.f32.vlgmr.msra.gmra.mxu1 %v2763_v34 }
 0x455   : > { %v2853_v36 = vpop.f32.mrf.mxu1 }
 0x456   : > { %v2854_v37 = vadd.f32 %v3002_v35, %v2853_v36 }
 0x457   : > { %v3843_v38 = vpop.f32.mrf.mxu1 }
 0x458   : > { %2857 = vst [vmem:[%s375_s24] sm:$0xff] %v2854_v37 }
 0x459 PF: > { %p20_p11 = scmp.ge.s32.totalorder %s4335_s14, 5   ;;  %s4544_s24 = smov %s4173_s25 }
 0x45a   : > { %s4545_s25 = smov %s4177_s26  ;;  %s4546_s26 = smov %s4347_s18 }
 0x45b   : > { %s4547_s27 = smov %s4335_s14  ;;  %22 = sbr.rel (!%p20_p11) target bundleno = 6 (0x6), region = 112 }
 0x460   :  { %2877 = vsyncpa [#allocation3], 1 }
 0x461   :  { %2879 = vsyncpa [#allocation3 + $0x1], 1 }
 0x462   :  { %2880 = vsyncpa [#allocation5], 1 }
 0x463   :  { %2881 = vsyncpa [#allocation8], 1 }
 0x464   :  { %2882 = vsyncpa [#allocation11], 1 }

</bundles_post_ra>
